<compile_context>
chip_gen: v7x
topology: tpu7x:2x2x1
jax: 0.10.0
libtpu: 0.0.40
codegen_flags: <defaults>
</compile_context>

<pallas_src>
import numpy as np
import jax
import jax.numpy as jnp
from jax import lax
from jax.experimental import pallas as pl
from jax.experimental.pallas import tpu as pltpu

LANE = 128


def _round_up(n, m):
    return (n + m - 1) // m * m


def _pad_to(a, shape):
    return jnp.pad(a, [(0, s - d) for d, s in zip(a.shape, shape)])


# --------------------------------------------------------------------------- #
# Kernel
# --------------------------------------------------------------------------- #
def encoder_prenet_kernel(
    x_ref,                    # (Bb, T, Dp)
    w_lin_ref, b_lin_ref,     # (Dp, Dp), (1, Dp)
    w1_ref, b1_ref,           # (K, Dp, Dp), (1, Dp)   (conv bias + BN folded)
    w2_ref, b2_ref,
    w3_ref, b3_ref,
    w_proj_ref, b_proj_ref,   # (Dp, OUTp), (1, OUTp)
    out_ref,                  # (Bb, T, OUTp)
):
    Bb, T, D = x_ref.shape
    K = w1_ref.shape[0]
    pad = K // 2
    R = Bb * T

    # ---- input Linear: (R, Dp) @ (Dp, Dp) + bias ----
    h = x_ref[...].reshape(R, D)
    h = jnp.dot(h, w_lin_ref[...], preferred_element_type=jnp.float32) + b_lin_ref[...]

    # Per-tap shift / validity mask, computed once and shared by all 3 layers.
    # Row t of the flattened (Bb*T) axis belongs to sequence position t % T.
    t_in_seq = lax.broadcasted_iota(jnp.int32, (R, 1), 0) % T
    taps = []
    for k in range(K):
        if k == pad:
            continue
        shift = (pad - k) % R                       # static circular shift
        valid = jnp.logical_and(t_in_seq >= pad - k, t_in_seq < T + pad - k)
        taps.append((k, shift, valid))

    def conv_bn_relu(h, w_ref, b_ref):
        # Center tap: no shift, no mask.
        acc = jnp.dot(h, w_ref[pad], preferred_element_type=jnp.float32)
        for k, shift, valid in taps:
            c = jnp.dot(h, w_ref[k], preferred_element_type=jnp.float32)
            c = pltpu.roll(c, shift=shift, axis=0)  # XLU: realign tap k rows
            acc = acc + jnp.where(valid, c, 0.0)    # zero rows that wrapped
        acc = acc + b_ref[...]                      # conv bias + BatchNorm (eval) folded
        return jnp.maximum(acc, 0.0)                # ReLU
        # TODO(synk): train-mode dropout is stochastic; eval-mode identity here.

    h = conv_bn_relu(h, w1_ref, b1_ref)
    h = conv_bn_relu(h, w2_ref, b2_ref)
    h = conv_bn_relu(h, w3_ref, b3_ref)

    # ---- output projection ----
    y = jnp.dot(h, w_proj_ref[...], preferred_element_type=jnp.float32) + b_proj_ref[...]
    out_ref[...] = y.reshape(Bb, T, out_ref.shape[2]).astype(out_ref.dtype)


# --------------------------------------------------------------------------- #
# Wrapper: fold BN, transpose to matmul layout, pad to lane-dense shapes
# --------------------------------------------------------------------------- #
def fold_and_pad_params(raw, eps=1e-5):
    D = raw["linear_w"].shape[0]
    out_dim = raw["projection_w"].shape[0]
    K = raw["conv1_w"].shape[-1]
    Dp = _round_up(D, LANE)
    OUTp = _round_up(out_dim, LANE)

    p = {}
    p["w_lin"] = _pad_to(raw["linear_w"].T, (Dp, Dp))
    p["b_lin"] = _pad_to(raw["linear_b"][None, :], (1, Dp))
    for i in (1, 2, 3):
        w = raw[f"conv{i}_w"]                       # (D_out, D_in, K)  PyTorch layout
        b = raw[f"conv{i}_b"]
        g, beta = raw[f"bn{i}_gamma"], raw[f"bn{i}_beta"]
        m, v = raw[f"bn{i}_mean"], raw[f"bn{i}_var"]
        scale = g / jnp.sqrt(v + eps)               # (D_out,)
        wk = jnp.transpose(w, (2, 1, 0)) * scale    # (K, D_in, D_out), BN folded in
        p[f"w{i}"] = _pad_to(wk, (K, Dp, Dp))
        p[f"b{i}"] = _pad_to(((b - m) * scale + beta)[None, :], (1, Dp))
    p["w_proj"] = _pad_to(raw["projection_w"].T, (Dp, OUTp))
    p["b_proj"] = _pad_to(raw["projection_b"][None, :], (1, OUTp))
    return p, Dp, OUTp


def _choose_block_b(B, T, max_rows=512):
    best = 1
    for c in range(1, B + 1):
        if B % c:
            continue
        if c > 1 and c * T > max_rows:
            continue
        if B >= 2 and B // c < 2:       # keep >= 2 grid steps for megacore
            continue
        best = c
    return best


def encoder_prenet(x, raw_params, *, block_b=None):
    """x: (B, T, D) float32, channels-last. raw_params: PyTorch-layout params."""
    B, T, D = x.shape
    packed, Dp, OUTp = fold_and_pad_params(raw_params)
    out_dim = raw_params["projection_w"].shape[0]

    if block_b is None:
        block_b = _choose_block_b(B, T)
    assert B % block_b == 0

    xp = _pad_to(x, (B, T, Dp))

    ordered = [
        packed["w_lin"], packed["b_lin"],
        packed["w1"], packed["b1"],
        packed["w2"], packed["b2"],
        packed["w3"], packed["b3"],
        packed["w_proj"], packed["b_proj"],
    ]

    def const_spec(a):
        nd = a.ndim
        return pl.BlockSpec(a.shape, lambda b, _nd=nd: (0,) * _nd)

    in_specs = [pl.BlockSpec((block_b, T, Dp), lambda b: (b, 0, 0))]
    in_specs += [const_spec(a) for a in ordered]

    yp = pl.pallas_call(
        encoder_prenet_kernel,
        out_shape=jax.ShapeDtypeStruct((B, T, OUTp), jnp.float32),
        grid_spec=pltpu.PrefetchScalarGridSpec(
            num_scalar_prefetch=0,
            grid=(B // block_b,),
            in_specs=in_specs,
            out_specs=pl.BlockSpec((block_b, T, OUTp), lambda b: (b, 0, 0)),
        ),
        compiler_params=pltpu.CompilerParams(
            dimension_semantics=("parallel",),  # batch items independent -> both TCs on v7x
        ),
    )(xp, *ordered)
    return yp[:, :, :out_dim]


# --------------------------------------------------------------------------- #
# Pure-JAX reference with PyTorch eval-mode semantics
# --------------------------------------------------------------------------- #
def reference_forward(x, raw, eps=1e-5):
    hp = lax.Precision.HIGHEST
    h = jnp.einsum("btd,ed->bte", x, raw["linear_w"], precision=hp) + raw["linear_b"]
    h = jnp.transpose(h, (0, 2, 1))                 # (B, D, T)  (NCW)
    for i in (1, 2, 3):
        w = raw[f"conv{i}_w"]
        pad = w.shape[-1] // 2
        h = lax.conv_general_dilated(
            h, w, window_strides=(1,), padding=[(pad, pad)],
            dimension_numbers=("NCH", "OIH", "NCH"), precision=hp,
        ) + raw[f"conv{i}_b"][None, :, None]
        m, v = raw[f"bn{i}_mean"], raw[f"bn{i}_var"]
        g, b = raw[f"bn{i}_gamma"], raw[f"bn{i}_beta"]
        h = (h - m[None, :, None]) * (g / jnp.sqrt(v + eps))[None, :, None] + b[None, :, None]
        h = jnp.maximum(h, 0.0)
    h = jnp.transpose(h, (0, 2, 1))                 # (B, T, D)
    return jnp.einsum("btd,od->bto", h, raw["projection_w"], precision=hp) + raw["projection_b"]


def make_params(key, embed_dim, kernel_size, out_dim):
    keys = iter(jax.random.split(key, 24))
    n = lambda shape, s=0.1: s * jax.random.normal(next(keys), shape, jnp.float32)
    raw = {
        "linear_w": n((embed_dim, embed_dim)),      # PyTorch Linear: (out, in)
        "linear_b": n((embed_dim,)),
        "projection_w": n((out_dim, embed_dim)),
        "projection_b": n((out_dim,)),
    }
    for i in (1, 2, 3):
        raw[f"conv{i}_w"] = n((embed_dim, embed_dim, kernel_size))  # (D_out, D_in, K)
        raw[f"conv{i}_b"] = n((embed_dim,))
        raw[f"bn{i}_gamma"] = 1.0 + n((embed_dim,))
        raw[f"bn{i}_beta"] = n((embed_dim,))
        raw[f"bn{i}_mean"] = n((embed_dim,))
        raw[f"bn{i}_var"] = 1.0 + jnp.abs(n((embed_dim,)))
    return raw


if __name__ == "__main__":
    B, T = 4, 16
    embed_dim, kernel_size, out_dim = 32, 3, 16

    key = jax.random.PRNGKey(0)
    kx, kp = jax.random.split(key)
    x = jax.random.normal(kx, (B, T, embed_dim), jnp.float32)
    raw = make_params(kp, embed_dim, kernel_size, out_dim)

    out = jax.block_until_ready(encoder_prenet(x, raw))
    ref = jax.block_until_ready(reference_forward(x, raw))
    np.testing.assert_allclose(np.asarray(out), np.asarray(ref), rtol=1e-3, atol=1e-3)

    print("KERNEL_OK")
</pallas_src>

<mosaic_0001>
module attributes {stable_mosaic.version = 11 : i64} {
  func.func @encoder_prenet_kernel(%arg0: i32, %arg1: memref<2x16x128xf32, #tpu.memory_space<vmem>>, %arg2: memref<128x128xf32, #tpu.memory_space<vmem>>, %arg3: memref<1x128xf32, #tpu.memory_space<vmem>>, %arg4: memref<3x128x128xf32, #tpu.memory_space<vmem>>, %arg5: memref<1x128xf32, #tpu.memory_space<vmem>>, %arg6: memref<3x128x128xf32, #tpu.memory_space<vmem>>, %arg7: memref<1x128xf32, #tpu.memory_space<vmem>>, %arg8: memref<3x128x128xf32, #tpu.memory_space<vmem>>, %arg9: memref<1x128xf32, #tpu.memory_space<vmem>>, %arg10: memref<128x128xf32, #tpu.memory_space<vmem>>, %arg11: memref<1x128xf32, #tpu.memory_space<vmem>>, %arg12: memref<2x16x128xf32, #tpu.memory_space<vmem>>) attributes {dimension_semantics = [#tpu.dimension_semantics<parallel>], iteration_bounds = array<i64: 2>, scalar_prefetch = 0 : i64, scratch_operands = 0 : i64, tpu.core_type = #tpu.core_type<tc>, window_params = [{transform_indices = @transform_0, window_bounds = array<i64: 2, 16, 128>}, {pipeline_mode = #tpu.pipeline_mode<synchronous>, transform_indices = @transform_1, window_bounds = array<i64: 128, 128>}, {pipeline_mode = #tpu.pipeline_mode<synchronous>, transform_indices = @transform_2, window_bounds = array<i64: 1, 128>}, {pipeline_mode = #tpu.pipeline_mode<synchronous>, transform_indices = @transform_3, window_bounds = array<i64: 3, 128, 128>}, {pipeline_mode = #tpu.pipeline_mode<synchronous>, transform_indices = @transform_4, window_bounds = array<i64: 1, 128>}, {pipeline_mode = #tpu.pipeline_mode<synchronous>, transform_indices = @transform_5, window_bounds = array<i64: 3, 128, 128>}, {pipeline_mode = #tpu.pipeline_mode<synchronous>, transform_indices = @transform_6, window_bounds = array<i64: 1, 128>}, {pipeline_mode = #tpu.pipeline_mode<synchronous>, transform_indices = @transform_7, window_bounds = array<i64: 3, 128, 128>}, {pipeline_mode = #tpu.pipeline_mode<synchronous>, transform_indices = @transform_8, window_bounds = array<i64: 1, 128>}, {pipeline_mode = #tpu.pipeline_mode<synchronous>, transform_indices = @transform_9, window_bounds = array<i64: 128, 128>}, {pipeline_mode = #tpu.pipeline_mode<synchronous>, transform_indices = @transform_10, window_bounds = array<i64: 1, 128>}, {transform_indices = @transform_11, window_bounds = array<i64: 2, 16, 128>}]} {
    %c0 = arith.constant 0 : index
    %c0_0 = arith.constant 0 : index
    %c0_1 = arith.constant 0 : index
    %0 = vector.load %arg1[%c0, %c0_0, %c0_1] : memref<2x16x128xf32, #tpu.memory_space<vmem>>, vector<2x16x128xf32>
    %1 = vector.shape_cast %0 : vector<2x16x128xf32> to vector<32x128xf32>
    %c0_2 = arith.constant 0 : index
    %c0_3 = arith.constant 0 : index
    %2 = vector.load %arg2[%c0_2, %c0_3] : memref<128x128xf32, #tpu.memory_space<vmem>>, vector<128x128xf32>
    %cst = arith.constant dense<0.000000e+00> : vector<32x128xf32>
    %3 = tpu.matmul %1, %2, %cst {dimension_numbers = #tpu.dot_dimension_numbers<[1], [0], [0], [1], [0, 0, 1, 1], [], []>} : vector<32x128xf32>, vector<128x128xf32>, vector<32x128xf32> -> vector<32x128xf32>
    %c0_4 = arith.constant 0 : index
    %c0_5 = arith.constant 0 : index
    %4 = vector.load %arg3[%c0_4, %c0_5] : memref<1x128xf32, #tpu.memory_space<vmem>>, vector<1x128xf32>
    %5 = vector.broadcast %4 : vector<1x128xf32> to vector<32x128xf32>
    %6 = arith.addf %3, %5 : vector<32x128xf32>
    %7 = tpu.iota {dimensions = array<i32: 0>} : vector<32x1xi32>
    %c16_i32 = arith.constant 16 : i32
    %c0_i32 = arith.constant 0 : i32
    %8 = arith.cmpi eq, %c16_i32, %c0_i32 : i32
    %c1_i32 = arith.constant 1 : i32
    %9 = arith.select %8, %c1_i32, %c16_i32 : i32
    %10 = vector.broadcast %9 : i32 to vector<32x1xi32>
    %11 = arith.remsi %7, %10 : vector<32x1xi32>
    %c0_i32_6 = arith.constant 0 : i32
    %12 = vector.broadcast %c0_i32_6 : i32 to vector<32x1xi32>
    %13 = arith.cmpi ne, %11, %12 : vector<32x1xi32>
    %c0_i32_7 = arith.constant 0 : i32
    %14 = vector.broadcast %c0_i32_7 : i32 to vector<32x1xi32>
    %15 = arith.cmpi slt, %11, %14 : vector<32x1xi32>
    %c0_i32_8 = arith.constant 0 : i32
    %16 = arith.cmpi slt, %9, %c0_i32_8 : i32
    %17 = vector.broadcast %16 : i1 to vector<32x1xi1>
    %18 = vector.broadcast %17 : vector<32x1xi1> to vector<32x1xi1>
    %19 = arith.xori %15, %18 : vector<32x1xi1>
    %20 = arith.andi %19, %13 : vector<32x1xi1>
    %21 = vector.broadcast %9 : i32 to vector<32x1xi32>
    %22 = arith.addi %11, %21 : vector<32x1xi32>
    %23 = arith.select %20, %22, %11 : vector<32x1xi1>, vector<32x1xi32>
    %c1_i32_9 = arith.constant 1 : i32
    %24 = vector.broadcast %c1_i32_9 : i32 to vector<32x1xi32>
    %25 = arith.cmpi sge, %23, %24 : vector<32x1xi32>
    %c17_i32 = arith.constant 17 : i32
    %26 = vector.broadcast %c17_i32 : i32 to vector<32x1xi32>
    %27 = arith.cmpi slt, %23, %26 : vector<32x1xi32>
    %28 = arith.andi %25, %27 : vector<32x1xi1>
    %c-1_i32 = arith.constant -1 : i32
    %29 = vector.broadcast %c-1_i32 : i32 to vector<32x1xi32>
    %30 = arith.cmpi sge, %23, %29 : vector<32x1xi32>
    %c15_i32 = arith.constant 15 : i32
    %31 = vector.broadcast %c15_i32 : i32 to vector<32x1xi32>
    %32 = arith.cmpi slt, %23, %31 : vector<32x1xi32>
    %33 = arith.andi %30, %32 : vector<32x1xi1>
    %c1 = arith.constant 1 : index
    %c0_10 = arith.constant 0 : index
    %c0_11 = arith.constant 0 : index
    %34 = vector.load %arg4[%c1, %c0_10, %c0_11] : memref<3x128x128xf32, #tpu.memory_space<vmem>>, vector<1x128x128xf32>
    %35 = vector.shape_cast %34 : vector<1x128x128xf32> to vector<128x128xf32>
    %cst_12 = arith.constant dense<0.000000e+00> : vector<32x128xf32>
    %36 = tpu.matmul %6, %35, %cst_12 {dimension_numbers = #tpu.dot_dimension_numbers<[1], [0], [0], [1], [0, 0, 1, 1], [], []>} : vector<32x128xf32>, vector<128x128xf32>, vector<32x128xf32> -> vector<32x128xf32>
    %c0_13 = arith.constant 0 : index
    %c0_14 = arith.constant 0 : index
    %c0_15 = arith.constant 0 : index
    %37 = vector.load %arg4[%c0_13, %c0_14, %c0_15] : memref<3x128x128xf32, #tpu.memory_space<vmem>>, vector<1x128x128xf32>
    %38 = vector.shape_cast %37 : vector<1x128x128xf32> to vector<128x128xf32>
    %cst_16 = arith.constant dense<0.000000e+00> : vector<32x128xf32>
    %39 = tpu.matmul %6, %38, %cst_16 {dimension_numbers = #tpu.dot_dimension_numbers<[1], [0], [0], [1], [0, 0, 1, 1], [], []>} : vector<32x128xf32>, vector<128x128xf32>, vector<32x128xf32> -> vector<32x128xf32>
    %c1_i32_17 = arith.constant 1 : i32
    %40 = tpu.dynamic_rotate %39 by %c1_i32_17 dim 0 : vector<32x128xf32>, i32 -> vector<32x128xf32>
    %cst_18 = arith.constant 0.000000e+00 : f32
    %41 = vector.shape_cast %28 : vector<32x1xi1> to vector<32x1xi1>
    %42 = vector.broadcast %41 : vector<32x1xi1> to vector<32x128xi1>
    %43 = vector.broadcast %cst_18 : f32 to vector<32x128xf32>
    %44 = arith.select %42, %40, %43 : vector<32x128xi1>, vector<32x128xf32>
    %45 = arith.addf %36, %44 : vector<32x128xf32>
    %c2 = arith.constant 2 : index
    %c0_19 = arith.constant 0 : index
    %c0_20 = arith.constant 0 : index
    %46 = vector.load %arg4[%c2, %c0_19, %c0_20] : memref<3x128x128xf32, #tpu.memory_space<vmem>>, vector<1x128x128xf32>
    %47 = vector.shape_cast %46 : vector<1x128x128xf32> to vector<128x128xf32>
    %cst_21 = arith.constant dense<0.000000e+00> : vector<32x128xf32>
    %48 = tpu.matmul %6, %47, %cst_21 {dimension_numbers = #tpu.dot_dimension_numbers<[1], [0], [0], [1], [0, 0, 1, 1], [], []>} : vector<32x128xf32>, vector<128x128xf32>, vector<32x128xf32> -> vector<32x128xf32>
    %c31_i32 = arith.constant 31 : i32
    %49 = tpu.dynamic_rotate %48 by %c31_i32 dim 0 : vector<32x128xf32>, i32 -> vector<32x128xf32>
    %cst_22 = arith.constant 0.000000e+00 : f32
    %50 = vector.shape_cast %33 : vector<32x1xi1> to vector<32x1xi1>
    %51 = vector.broadcast %50 : vector<32x1xi1> to vector<32x128xi1>
    %52 = vector.broadcast %cst_22 : f32 to vector<32x128xf32>
    %53 = arith.select %51, %49, %52 : vector<32x128xi1>, vector<32x128xf32>
    %54 = arith.addf %45, %53 : vector<32x128xf32>
    %c0_23 = arith.constant 0 : index
    %c0_24 = arith.constant 0 : index
    %55 = vector.load %arg5[%c0_23, %c0_24] : memref<1x128xf32, #tpu.memory_space<vmem>>, vector<1x128xf32>
    %56 = vector.broadcast %55 : vector<1x128xf32> to vector<32x128xf32>
    %57 = arith.addf %54, %56 : vector<32x128xf32>
    %cst_25 = arith.constant 0.000000e+00 : f32
    %58 = vector.broadcast %cst_25 : f32 to vector<32x128xf32>
    %59 = arith.maximumf %57, %58 : vector<32x128xf32>
    %c1_26 = arith.constant 1 : index
    %c0_27 = arith.constant 0 : index
    %c0_28 = arith.constant 0 : index
    %60 = vector.load %arg6[%c1_26, %c0_27, %c0_28] : memref<3x128x128xf32, #tpu.memory_space<vmem>>, vector<1x128x128xf32>
    %61 = vector.shape_cast %60 : vector<1x128x128xf32> to vector<128x128xf32>
    %cst_29 = arith.constant dense<0.000000e+00> : vector<32x128xf32>
    %62 = tpu.matmul %59, %61, %cst_29 {dimension_numbers = #tpu.dot_dimension_numbers<[1], [0], [0], [1], [0, 0, 1, 1], [], []>} : vector<32x128xf32>, vector<128x128xf32>, vector<32x128xf32> -> vector<32x128xf32>
    %c0_30 = arith.constant 0 : index
    %c0_31 = arith.constant 0 : index
    %c0_32 = arith.constant 0 : index
    %63 = vector.load %arg6[%c0_30, %c0_31, %c0_32] : memref<3x128x128xf32, #tpu.memory_space<vmem>>, vector<1x128x128xf32>
    %64 = vector.shape_cast %63 : vector<1x128x128xf32> to vector<128x128xf32>
    %cst_33 = arith.constant dense<0.000000e+00> : vector<32x128xf32>
    %65 = tpu.matmul %59, %64, %cst_33 {dimension_numbers = #tpu.dot_dimension_numbers<[1], [0], [0], [1], [0, 0, 1, 1], [], []>} : vector<32x128xf32>, vector<128x128xf32>, vector<32x128xf32> -> vector<32x128xf32>
    %c1_i32_34 = arith.constant 1 : i32
    %66 = tpu.dynamic_rotate %65 by %c1_i32_34 dim 0 : vector<32x128xf32>, i32 -> vector<32x128xf32>
    %cst_35 = arith.constant 0.000000e+00 : f32
    %67 = vector.shape_cast %28 : vector<32x1xi1> to vector<32x1xi1>
    %68 = vector.broadcast %67 : vector<32x1xi1> to vector<32x128xi1>
    %69 = vector.broadcast %cst_35 : f32 to vector<32x128xf32>
    %70 = arith.select %68, %66, %69 : vector<32x128xi1>, vector<32x128xf32>
    %71 = arith.addf %62, %70 : vector<32x128xf32>
    %c2_36 = arith.constant 2 : index
    %c0_37 = arith.constant 0 : index
    %c0_38 = arith.constant 0 : index
    %72 = vector.load %arg6[%c2_36, %c0_37, %c0_38] : memref<3x128x128xf32, #tpu.memory_space<vmem>>, vector<1x128x128xf32>
    %73 = vector.shape_cast %72 : vector<1x128x128xf32> to vector<128x128xf32>
    %cst_39 = arith.constant dense<0.000000e+00> : vector<32x128xf32>
    %74 = tpu.matmul %59, %73, %cst_39 {dimension_numbers = #tpu.dot_dimension_numbers<[1], [0], [0], [1], [0, 0, 1, 1], [], []>} : vector<32x128xf32>, vector<128x128xf32>, vector<32x128xf32> -> vector<32x128xf32>
    %c31_i32_40 = arith.constant 31 : i32
    %75 = tpu.dynamic_rotate %74 by %c31_i32_40 dim 0 : vector<32x128xf32>, i32 -> vector<32x128xf32>
    %cst_41 = arith.constant 0.000000e+00 : f32
    %76 = vector.shape_cast %33 : vector<32x1xi1> to vector<32x1xi1>
    %77 = vector.broadcast %76 : vector<32x1xi1> to vector<32x128xi1>
    %78 = vector.broadcast %cst_41 : f32 to vector<32x128xf32>
    %79 = arith.select %77, %75, %78 : vector<32x128xi1>, vector<32x128xf32>
    %80 = arith.addf %71, %79 : vector<32x128xf32>
    %c0_42 = arith.constant 0 : index
    %c0_43 = arith.constant 0 : index
    %81 = vector.load %arg7[%c0_42, %c0_43] : memref<1x128xf32, #tpu.memory_space<vmem>>, vector<1x128xf32>
    %82 = vector.broadcast %81 : vector<1x128xf32> to vector<32x128xf32>
    %83 = arith.addf %80, %82 : vector<32x128xf32>
    %cst_44 = arith.constant 0.000000e+00 : f32
    %84 = vector.broadcast %cst_44 : f32 to vector<32x128xf32>
    %85 = arith.maximumf %83, %84 : vector<32x128xf32>
    %c1_45 = arith.constant 1 : index
    %c0_46 = arith.constant 0 : index
    %c0_47 = arith.constant 0 : index
    %86 = vector.load %arg8[%c1_45, %c0_46, %c0_47] : memref<3x128x128xf32, #tpu.memory_space<vmem>>, vector<1x128x128xf32>
    %87 = vector.shape_cast %86 : vector<1x128x128xf32> to vector<128x128xf32>
    %cst_48 = arith.constant dense<0.000000e+00> : vector<32x128xf32>
    %88 = tpu.matmul %85, %87, %cst_48 {dimension_numbers = #tpu.dot_dimension_numbers<[1], [0], [0], [1], [0, 0, 1, 1], [], []>} : vector<32x128xf32>, vector<128x128xf32>, vector<32x128xf32> -> vector<32x128xf32>
    %c0_49 = arith.constant 0 : index
    %c0_50 = arith.constant 0 : index
    %c0_51 = arith.constant 0 : index
    %89 = vector.load %arg8[%c0_49, %c0_50, %c0_51] : memref<3x128x128xf32, #tpu.memory_space<vmem>>, vector<1x128x128xf32>
    %90 = vector.shape_cast %89 : vector<1x128x128xf32> to vector<128x128xf32>
    %cst_52 = arith.constant dense<0.000000e+00> : vector<32x128xf32>
    %91 = tpu.matmul %85, %90, %cst_52 {dimension_numbers = #tpu.dot_dimension_numbers<[1], [0], [0], [1], [0, 0, 1, 1], [], []>} : vector<32x128xf32>, vector<128x128xf32>, vector<32x128xf32> -> vector<32x128xf32>
    %c1_i32_53 = arith.constant 1 : i32
    %92 = tpu.dynamic_rotate %91 by %c1_i32_53 dim 0 : vector<32x128xf32>, i32 -> vector<32x128xf32>
    %cst_54 = arith.constant 0.000000e+00 : f32
    %93 = vector.shape_cast %28 : vector<32x1xi1> to vector<32x1xi1>
    %94 = vector.broadcast %93 : vector<32x1xi1> to vector<32x128xi1>
    %95 = vector.broadcast %cst_54 : f32 to vector<32x128xf32>
    %96 = arith.select %94, %92, %95 : vector<32x128xi1>, vector<32x128xf32>
    %97 = arith.addf %88, %96 : vector<32x128xf32>
    %c2_55 = arith.constant 2 : index
    %c0_56 = arith.constant 0 : index
    %c0_57 = arith.constant 0 : index
    %98 = vector.load %arg8[%c2_55, %c0_56, %c0_57] : memref<3x128x128xf32, #tpu.memory_space<vmem>>, vector<1x128x128xf32>
    %99 = vector.shape_cast %98 : vector<1x128x128xf32> to vector<128x128xf32>
    %cst_58 = arith.constant dense<0.000000e+00> : vector<32x128xf32>
    %100 = tpu.matmul %85, %99, %cst_58 {dimension_numbers = #tpu.dot_dimension_numbers<[1], [0], [0], [1], [0, 0, 1, 1], [], []>} : vector<32x128xf32>, vector<128x128xf32>, vector<32x128xf32> -> vector<32x128xf32>
    %c31_i32_59 = arith.constant 31 : i32
    %101 = tpu.dynamic_rotate %100 by %c31_i32_59 dim 0 : vector<32x128xf32>, i32 -> vector<32x128xf32>
    %cst_60 = arith.constant 0.000000e+00 : f32
    %102 = vector.shape_cast %33 : vector<32x1xi1> to vector<32x1xi1>
    %103 = vector.broadcast %102 : vector<32x1xi1> to vector<32x128xi1>
    %104 = vector.broadcast %cst_60 : f32 to vector<32x128xf32>
    %105 = arith.select %103, %101, %104 : vector<32x128xi1>, vector<32x128xf32>
    %106 = arith.addf %97, %105 : vector<32x128xf32>
    %c0_61 = arith.constant 0 : index
    %c0_62 = arith.constant 0 : index
    %107 = vector.load %arg9[%c0_61, %c0_62] : memref<1x128xf32, #tpu.memory_space<vmem>>, vector<1x128xf32>
    %108 = vector.broadcast %107 : vector<1x128xf32> to vector<32x128xf32>
    %109 = arith.addf %106, %108 : vector<32x128xf32>
    %cst_63 = arith.constant 0.000000e+00 : f32
    %110 = vector.broadcast %cst_63 : f32 to vector<32x128xf32>
    %111 = arith.maximumf %109, %110 : vector<32x128xf32>
    %c0_64 = arith.constant 0 : index
    %c0_65 = arith.constant 0 : index
    %112 = vector.load %arg10[%c0_64, %c0_65] : memref<128x128xf32, #tpu.memory_space<vmem>>, vector<128x128xf32>
    %cst_66 = arith.constant dense<0.000000e+00> : vector<32x128xf32>
    %113 = tpu.matmul %111, %112, %cst_66 {dimension_numbers = #tpu.dot_dimension_numbers<[1], [0], [0], [1], [0, 0, 1, 1], [], []>} : vector<32x128xf32>, vector<128x128xf32>, vector<32x128xf32> -> vector<32x128xf32>
    %c0_67 = arith.constant 0 : index
    %c0_68 = arith.constant 0 : index
    %114 = vector.load %arg11[%c0_67, %c0_68] : memref<1x128xf32, #tpu.memory_space<vmem>>, vector<1x128xf32>
    %115 = vector.broadcast %114 : vector<1x128xf32> to vector<32x128xf32>
    %116 = arith.addf %113, %115 : vector<32x128xf32>
    %117 = vector.shape_cast %116 : vector<32x128xf32> to vector<2x16x128xf32>
    %c0_69 = arith.constant 0 : index
    %c0_70 = arith.constant 0 : index
    %c0_71 = arith.constant 0 : index
    %118 = vector.load %arg12[%c0_69, %c0_70, %c0_71] : memref<2x16x128xf32, #tpu.memory_space<vmem>>, vector<2x16x128xf32>
    tpu.vector_store %arg12[%c0_69, %c0_70, %c0_71], %117 {strides = array<i32>} : memref<2x16x128xf32, #tpu.memory_space<vmem>>, vector<2x16x128xf32>,
    return
  }
  func.func @transform_0(%arg0: i32) -> (i32, i32, i32) {
    %c0_i32 = arith.constant 0 : i32
    %c0_i32_0 = arith.constant 0 : i32
    %c0_i32_1 = arith.constant 0 : i32
    return %arg0, %c0_i32, %c0_i32_0 : i32, i32, i32
  }
  func.func @transform_1(%arg0: i32) -> (i32, i32) {
    %c0_i32 = arith.constant 0 : i32
    %c0_i32_0 = arith.constant 0 : i32
    %c0_i32_1 = arith.constant 0 : i32
    return %c0_i32, %c0_i32_0 : i32, i32
  }
  func.func @transform_2(%arg0: i32) -> (i32, i32) {
    %c0_i32 = arith.constant 0 : i32
    %c0_i32_0 = arith.constant 0 : i32
    %c0_i32_1 = arith.constant 0 : i32
    return %c0_i32, %c0_i32_0 : i32, i32
  }
  func.func @transform_3(%arg0: i32) -> (i32, i32, i32) {
    %c0_i32 = arith.constant 0 : i32
    %c0_i32_0 = arith.constant 0 : i32
    %c0_i32_1 = arith.constant 0 : i32
    %c0_i32_2 = arith.constant 0 : i32
    return %c0_i32, %c0_i32_0, %c0_i32_1 : i32, i32, i32
  }
  func.func @transform_4(%arg0: i32) -> (i32, i32) {
    %c0_i32 = arith.constant 0 : i32
    %c0_i32_0 = arith.constant 0 : i32
    %c0_i32_1 = arith.constant 0 : i32
    return %c0_i32, %c0_i32_0 : i32, i32
  }
  func.func @transform_5(%arg0: i32) -> (i32, i32, i32) {
    %c0_i32 = arith.constant 0 : i32
    %c0_i32_0 = arith.constant 0 : i32
    %c0_i32_1 = arith.constant 0 : i32
    %c0_i32_2 = arith.constant 0 : i32
    return %c0_i32, %c0_i32_0, %c0_i32_1 : i32, i32, i32
  }
  func.func @transform_6(%arg0: i32) -> (i32, i32) {
    %c0_i32 = arith.constant 0 : i32
    %c0_i32_0 = arith.constant 0 : i32
    %c0_i32_1 = arith.constant 0 : i32
    return %c0_i32, %c0_i32_0 : i32, i32
  }
  func.func @transform_7(%arg0: i32) -> (i32, i32, i32) {
    %c0_i32 = arith.constant 0 : i32
    %c0_i32_0 = arith.constant 0 : i32
    %c0_i32_1 = arith.constant 0 : i32
    %c0_i32_2 = arith.constant 0 : i32
    return %c0_i32, %c0_i32_0, %c0_i32_1 : i32, i32, i32
  }
  func.func @transform_8(%arg0: i32) -> (i32, i32) {
    %c0_i32 = arith.constant 0 : i32
    %c0_i32_0 = arith.constant 0 : i32
    %c0_i32_1 = arith.constant 0 : i32
    return %c0_i32, %c0_i32_0 : i32, i32
  }
  func.func @transform_9(%arg0: i32) -> (i32, i32) {
    %c0_i32 = arith.constant 0 : i32
    %c0_i32_0 = arith.constant 0 : i32
    %c0_i32_1 = arith.constant 0 : i32
    return %c0_i32, %c0_i32_0 : i32, i32
  }
  func.func @transform_10(%arg0: i32) -> (i32, i32) {
    %c0_i32 = arith.constant 0 : i32
    %c0_i32_0 = arith.constant 0 : i32
    %c0_i32_1 = arith.constant 0 : i32
    return %c0_i32, %c0_i32_0 : i32, i32
  }
  func.func @transform_11(%arg0: i32) -> (i32, i32, i32) {
    %c0_i32 = arith.constant 0 : i32
    %c0_i32_0 = arith.constant 0 : i32
    %c0_i32_1 = arith.constant 0 : i32
    return %arg0, %c0_i32, %c0_i32_0 : i32, i32, i32
  }
}

</mosaic_0001>

<bundles_post_ra>
// kernel: tpu_custom_call.1
= control target key start
LH: loop header
LB: loop body
LE: loop exit
PB: predicated region body
PF: predicated region fallthrough
CT: control target
= control target key end

     0   :  { %s3887_s0 = inlined_call_operand.hbm [shape: f32[4,16,128], index: 0, kind: input, shape index: {}]   ;;  %s3888_s1 = inlined_call_operand.hbm [shape: f32[128,128], index: 1, kind: input, shape index: {}]   ;;  %s3889_s2 = inlined_call_operand.vmem [shape: f32[1,128], index: 2, kind: input, shape index: {}]   ;;  %s3890_s3 = inlined_call_operand.hbm [shape: f32[3,128,128], index: 3, kind: input, shape index: {}]   ;;  %s3891_s4 = inlined_call_operand.vmem [shape: f32[1,128], index: 4, kind: input, shape index: {}]   ;;  %s3892_s5 = inlined_call_operand.hbm [shape: f32[3,128,128], index: 5, kind: input, shape index: {}]   ;;  %s3893_s6 = inlined_call_operand.vmem [shape: f32[1,128], index: 6, kind: input, shape index: {}]   ;;  %s3894_s7 = inlined_call_operand.hbm [shape: f32[3,128,128], index: 7, kind: input, shape index: {}]   ;;  %s3895_s8 = inlined_call_operand.vmem [shape: f32[1,128], index: 8, kind: input, shape index: {}]   ;;  %s3896_s9 = inlined_call_operand.hbm [shape: f32[128,128], index: 9, kind: input, shape index: {}]   ;;  %s3897_s10 = inlined_call_operand.vmem [shape: f32[1,128], index: 10, kind: input, shape index: {}]   ;;  %s3898_s11 = inlined_call_operand.hbm [shape: f32[4,16,128], index: 11, kind: output, shape index: {}]  }
   0x1   :  { %3904 = sst [smem:[#allocation19_spill]] %s3888_s1 }
   0x2   :  { %3905 = sst [smem:[#allocation20_spill]] %s3895_s8 }
   0x3   :  { %3906 = sst [smem:[#allocation21_spill]] %s3897_s10 }
   0x4   :  { %3907 = sst [smem:[#allocation22_spill]] %s3898_s11 }
   0x5   :  { %16 = vsyncpa [#allocation3], 0 }
   0x6   :  { %18 = vsyncpa [#allocation3 + $0x1], 0 }
   0x7   :  { %19 = vsyncpa [#allocation6], 0 }
   0x8   :  { %20 = vsyncpa [#allocation9], 0 }
   0x9   :  { %21 = vsyncpa [#allocation12], 0 }
   0xa   :  { %22 = vsyncpa [#allocation4], 0 }
   0xb   :  { %24 = vsyncpa [#allocation4 + $0x1], 0  ;;  %s3443_s17 = smov 0   ;;  %s3445_s18 = smov 0  }
   0xc   :  { %s3447_s19 = smov 0   ;;  %s3449_s20 = smov 0  }
   0xd LB: > { %s3372_s21 = smov [#allocation5]   ;;  %s3464_s23 = sadd.s32 4294967295, %s3370_s20   ;;  %s3370_s20 = sphi %s3449_s20, %s3942_s20   ;;  %s3366_s19 = sphi %s3447_s19, %s3941_s19   ;;  %s3362_s18 = sphi %s3445_s18, %s3940_s18   ;;  %s3358_s17 = sphi %s3443_s17, %s3939_s17  }
   0xe   : > { %s309_s22 = sshll.u32 %s3372_s21, 4  ;;  %p1981_p0 = scmp.ge.s32.totalorder %s3370_s20, 1  ;;  %s3469_s22 = int_to_ptr.vmem [resolvable:$true] %s309_s22 }
   0xf   : > { %p3900_p1 = scmp.eq.s32.totalorder %s3464_s23, 0  ;;  %p297_p2 = scmp.lt.s32.totalorder %s3370_s20, 3 }
  0x10   : > { %s3373_s25 = smov [#allocation8]   ;;  %s3374_s28 = smov [#allocation7]  }
  0x11   : > { %p3471_p3 = pnand %p1981_p0, %p297_p2  ;;  %s341_s26 = sshll.u32 %s3373_s25, 4  ;;  %s3484_s26 = int_to_ptr.vmem [resolvable:$true] %s341_s26 }
  0x12   : > { %s325_s29 = sshll.u32 %s3374_s28, 4  ;;  %s3910_s1 = sld [smem:[#allocation19_spill]]  ;;  %s3486_s29 = int_to_ptr.vmem [resolvable:$true] %s325_s29 }
  0x13   : > { %s3908_s24 = scalar_select %p3471_p3, 1, 0 }
  0x14   : > { %p3045_p5 = pneg %p3471_p3 }
  0x16   : > { %p3480_p6 = pnand %p3045_p5, %p3900_p1 }
  0x18   : > { %s3122_s13 = scalar_lea.hbm %s3910_s1, 2048  ;;  %p3496_p8 = pneg %p3480_p6 }
  0x19   : > { %p3123_p7 = scmp.ne.s32.totalorder %s3910_s1, %s3122_s13  ;;  %p3129_p11 = scmp.lt.u32.totalorder %s3122_s13, %s3910_s1 }
  0x1b   : > { %p3125_p9 = pnand %p3496_p8, %p3123_p7 }
  0x1d   : > { %p3126_p10 = pneg %p3125_p9 }
  0x1f   : > { %p3131_p12 = pnand %p3129_p11, %p3126_p10 }
  0x21   : > { %3134 = shalt.err (!%p3131_p12)
}
  0x22   : > { %s3135_s28 = scalar_lea.vmem %s3469_s22, 2048  ;;  %p3143_p5 = scmp.lt.s32.totalorder %s3469_s22, %s3469_s22 }
  0x23   : > { %p3136_p13 = scmp.ne.s32.totalorder %s3469_s22, %s3135_s28  ;;  %p3144_p4 = scmp.lt.s32.totalorder %s3135_s28, %s3135_s28 }
  0x25   : > { %p3138_p0 = pnand %p3136_p13, %p3496_p8  ;;  %p3145_p7 = por %p3144_p4, %p3143_p5 }
  0x27   : > { %p3139_p2 = pneg %p3138_p0 }
  0x29   : > { %p3146_p9 = pnand %p3145_p7, %p3139_p2 }
  0x2b   : > { %3149 = shalt.err (!%p3146_p9)
}
  0x2c   : > { %s3902_s30 = smov 128   ;;  %s3376_s12 = smov 8  }
  0x2d   : > { %3048 = dma.hbm_to_vmem [thread:$0]  (!%p3480_p6), %s3910_s1, 2048, %s3469_s22, [#allocation6], %s3902_s30, %s3902_s30, %s3376_s12  }
  0x2e   : > { %s3150_s25 = scalar_lea.hbm %s3892_s5, 6144 }
  0x2f   : > { %p3151_p4 = scmp.ne.s32.totalorder %s3892_s5, %s3150_s25  ;;  %p3157_p12 = scmp.lt.u32.totalorder %s3150_s25, %s3892_s5 }
  0x31   : > { %p3153_p10 = pnand %p3151_p4, %p3496_p8 }
  0x33   : > { %p3154_p11 = pneg %p3153_p10 }
  0x35   : > { %p3159_p13 = pnand %p3157_p12, %p3154_p11 }
  0x37   : > { %3162 = shalt.err (!%p3159_p13)
}
  0x38   : > { %s3163_s22 = scalar_lea.vmem %s3484_s26, 6144  ;;  %p3171_p7 = scmp.lt.s32.totalorder %s3484_s26, %s3484_s26 }
  0x39   : > { %p3164_p0 = scmp.ne.s32.totalorder %s3484_s26, %s3163_s22  ;;  %p3172_p9 = scmp.lt.s32.totalorder %s3163_s22, %s3163_s22 }
  0x3b   : > { %p3166_p2 = pnand %p3164_p0, %p3496_p8  ;;  %p3173_p4 = por %p3172_p9, %p3171_p7 }
  0x3d   : > { %p3167_p5 = pneg %p3166_p2 }
  0x3f   : > { %p3174_p10 = pnand %p3173_p4, %p3167_p5 }
  0x41   : > { %3177 = shalt.err (!%p3174_p10)
}
  0x42   : > { %3054 = dma.hbm_to_vmem [thread:$0]  (!%p3480_p6), %s3892_s5, 6144, %s3484_s26, [#allocation9], %s3902_s30, %s3902_s30, %s3376_s12  }
  0x43   : > { %s3178_s14 = scalar_lea.hbm %s3890_s3, 6144 }
  0x44   : > { %p3179_p11 = scmp.ne.s32.totalorder %s3890_s3, %s3178_s14  ;;  %p3185_p0 = scmp.lt.u32.totalorder %s3178_s14, %s3890_s3 }
  0x46   : > { %p3181_p12 = pnand %p3179_p11, %p3496_p8 }
  0x48   : > { %p3182_p13 = pneg %p3181_p12 }
  0x4a   : > { %p3187_p2 = pnand %p3185_p0, %p3182_p13 }
  0x4c   : > { %3190 = shalt.err (!%p3187_p2)
}
  0x4d   : > { %s3191_s26 = scalar_lea.vmem %s3486_s29, 6144  ;;  %p3199_p4 = scmp.lt.s32.totalorder %s3486_s29, %s3486_s29 }
  0x4e   : > { %p3192_p5 = scmp.ne.s32.totalorder %s3486_s29, %s3191_s26  ;;  %p3200_p10 = scmp.lt.s32.totalorder %s3191_s26, %s3191_s26 }
  0x50   : > { %p3194_p7 = pnand %p3192_p5, %p3496_p8  ;;  %p3201_p11 = por %p3200_p10, %p3199_p4 }
  0x52   : > { %p3195_p9 = pneg %p3194_p7 }
  0x54   : > { %p3202_p12 = pnand %p3201_p11, %p3195_p9 }
  0x56   : > { %3205 = shalt.err (!%p3202_p12)
}
  0x57   : > { %3051 = dma.hbm_to_vmem [thread:$0]  (!%p3480_p6), %s3890_s3, 6144, %s3486_s29, [#allocation6], %s3902_s30, %s3902_s30, %s3376_s12  }
  0x58   : > { %s3377_s10 = smov [#allocation10]   ;;  %s3378_s13 = smov [#allocation11]  }
  0x59   : > { %s357_s11 = sshll.u32 %s3377_s10, 4  ;;  %s373_s14 = sshll.u32 %s3378_s13, 4  ;;  %s358_s11 = int_to_ptr.vmem [resolvable:$true] %s357_s11  ;;  %s374_s14 = int_to_ptr.vmem [resolvable:$true] %s373_s14 }
  0x5a   : > { %s3206_s25 = scalar_lea.hbm %s3894_s7, 6144 }
  0x5b   : > { %p3207_p13 = scmp.ne.s32.totalorder %s3894_s7, %s3206_s25  ;;  %p3213_p5 = scmp.lt.u32.totalorder %s3206_s25, %s3894_s7 }
  0x5d   : > { %p3209_p0 = pnand %p3207_p13, %p3496_p8 }
  0x5f   : > { %p3210_p2 = pneg %p3209_p0 }
  0x61   : > { %p3215_p7 = pnand %p3213_p5, %p3210_p2 }
  0x63   : > { %3218 = shalt.err (!%p3215_p7)
}
  0x64   : > { %s3219_s29 = scalar_lea.vmem %s358_s11, 6144  ;;  %p3227_p11 = scmp.lt.s32.totalorder %s358_s11, %s358_s11 }
  0x65   : > { %p3220_p9 = scmp.ne.s32.totalorder %s358_s11, %s3219_s29  ;;  %p3228_p12 = scmp.lt.s32.totalorder %s3219_s29, %s3219_s29 }
  0x67   : > { %p3222_p4 = pnand %p3220_p9, %p3496_p8  ;;  %p3229_p1 = por %p3228_p12, %p3227_p11 }
  0x69   : > { %p3223_p10 = pneg %p3222_p4 }
  0x6b   : > { %p3230_p3 = pnand %p3229_p1, %p3223_p10 }
  0x6d   : > { %3233 = shalt.err (!%p3230_p3)
}
  0x6e   : > { %3057 = dma.hbm_to_vmem [thread:$0]  (!%p3480_p6), %s3894_s7, 6144, %s358_s11, [#allocation9], %s3902_s30, %s3902_s30, %s3376_s12  }
  0x6f   : > { %s3234_s15 = scalar_lea.hbm %s3896_s9, 2048 }
  0x70   : > { %p3235_p1 = scmp.ne.s32.totalorder %s3896_s9, %s3234_s15  ;;  %p3241_p0 = scmp.lt.u32.totalorder %s3234_s15, %s3896_s9 }
  0x72   : > { %p3237_p3 = pnand %p3235_p1, %p3496_p8 }
  0x74   : > { %p3238_p13 = pneg %p3237_p3 }
  0x76   : > { %p3243_p2 = pnand %p3241_p0, %p3238_p13 }
  0x78   : > { %3246 = shalt.err (!%p3243_p2)
}
  0x79   : > { %s3247_s22 = scalar_lea.vmem %s374_s14, 2048  ;;  %p3255_p4 = scmp.lt.s32.totalorder %s374_s14, %s374_s14 }
  0x7a   : > { %p3248_p5 = scmp.ne.s32.totalorder %s374_s14, %s3247_s22  ;;  %p3256_p10 = scmp.lt.s32.totalorder %s3247_s22, %s3247_s22 }
  0x7c   : > { %p3250_p7 = pnand %p3248_p5, %p3496_p8  ;;  %p3257_p11 = por %p3256_p10, %p3255_p4 }
  0x7e   : > { %p3251_p9 = pneg %p3250_p7 }
  0x80   : > { %p3258_p12 = pnand %p3257_p11, %p3251_p9 }
  0x82   : > { %3261 = shalt.err (!%p3258_p12)
}
  0x83   : > { %3060 = dma.hbm_to_vmem [thread:$0]  (!%p3480_p6), %s3896_s9, 2048, %s374_s14, [#allocation12], %s3902_s30, %s3902_s30, %s3376_s12  }
  0x84   : > { %s1980_s27 = sadd.s32 4294967294, %s3370_s20   ;;  %s3616_s16 = sadd.s32 1, %s3370_s20  }
  0x85   : > { %s37_s1 = sadd.s32 1, %s3366_s19  ;;  %s34_s8 = ssub.s32 %s3370_s20, %s3616_s16 }
  0x86   : > { %p44_p8 = scmp.ne.s32.totalorder %s3366_s19, %s3362_s18  ;;  %p35_p1 = scmp.eq.s32.totalorder %s34_s8, 0 }
  0x87   : > { %p45_p3 = scmp.eq.s32.totalorder %s3370_s20, 0  ;;  %p50_p13 = scmp.ne.s32.totalorder %s3362_s18, %s3358_s17 }
  0x88   : > { %p284_p0 = scmp.eq.s32.totalorder %s3464_s23, 1  ;;  %p3912_p5 = scmp.eq.s32.totalorder %s3464_s23, 0 }
  0x89   : > { %s3628_s10 = scalar_select %p35_p1, %s3366_s19, %s37_s1  }
  0x8a   : > { %p46_p2 = por %p45_p3, %p44_p8  ;;  %p3632_p7 = por %p3912_p5, %p50_p13 }
  0x8b   : > { %p3636_p6 = por %p284_p0, %p44_p8  ;;  %p290_p9 = scmp.eq.s32.totalorder %s1980_s27, 1 }
  0x8c   : > { %p3074_p4 = scmp.lt.s32.totalorder %s3370_s20, 2  ;;  %s390_s15 = sand.u32 1, %s3366_s19  }
  0x8d   : > { %s3914_s14 = scalar_select %p3636_p6, 1, 0 }
  0x8e   : > { %p3642_p10 = por %p290_p9, %p50_p13  ;;  %s1988_s25 = sshll.u32 %s390_s15, 5 }
  0x8f   : > { %s2012_s28 = sshll.u32 %s3370_s20, 9  ;;  %s394_s29 = scalar_lea.vmem [#allocation2], %s1988_s25 }
  0x90   : > { %s3915_s21 = scalar_select %p3642_p10, 1, 0 }
  0x91   : > { %s3650_s11 = scalar_lea.hbm %s3887_s0, %s2012_s28  ;;  %s402_s1 = sshll.u32 %s394_s29, 4  ;;  %s3656_s1 = int_to_ptr.vmem [resolvable:$true] %s402_s1 }
  0x92   : > { %p3652_p11 = pnand %p3074_p4, %p46_p2  ;;  %s3658_s8 = scalar_lea.sflag [#allocation3], %s390_s15 }
  0x93   : > { %s3262_s30 = scalar_lea.hbm %s3650_s11, 512  ;;  %s3267_s26 = scalar_lea.hbm %s3887_s0, 1024 }
  0x94   : > { %p3263_p12 = scmp.ne.s32.totalorder %s3650_s11, %s3262_s30  ;;  %p3264_p8 = pneg %p3652_p11 }
  0x95   : > { %p3268_p13 = scmp.lt.u32.totalorder %s3650_s11, %s3887_s0  ;;  %p3269_p0 = scmp.lt.u32.totalorder %s3267_s26, %s3262_s30 }
  0x96   : > { %p3265_p1 = pnand %p3264_p8, %p3263_p12  ;;  %p3271_p5 = scmp.lt.u32.totalorder %s3262_s30, %s3650_s11 }
  0x97   : > { %p3270_p2 = por %p3269_p0, %p3268_p13 }
  0x98   : > { %p3266_p3 = pneg %p3265_p1 }
  0x99   : > { %p3272_p9 = por %p3271_p5, %p3270_p2 }
  0x9b   : > { %p3273_p4 = pnand %p3272_p9, %p3266_p3 }
  0x9d   : > { %3276 = shalt.err (!%p3273_p4)
}
  0x9e   : > { %s3277_s15 = scalar_lea.vmem %s3656_s1, 512  ;;  %s3379_s25 = smov [#allocation2]  }
  0x9f   : > { %p3278_p12 = scmp.ne.s32.totalorder %s3656_s1, %s3277_s15  ;;  %s3282_s28 = sshll.u32 %s3379_s25, 4  ;;  %s3283_s28 = int_to_ptr.vmem [resolvable:$false] %s3282_s28 }
  0xa0   : > { %s3284_s22 = scalar_lea.vmem %s3283_s28, 1024  ;;  %p3285_p6 = scmp.lt.s32.totalorder %s3656_s1, %s3283_s28 }
  0xa1   : > { %p3280_p1 = pnand %p3278_p12, %p3264_p8  ;;  %p3286_p13 = scmp.lt.s32.totalorder %s3284_s22, %s3277_s15 }
  0xa3   : > { %p3281_p10 = pneg %p3280_p1  ;;  %p3287_p0 = por %p3286_p13, %p3285_p6 }
  0xa5   : > { %p3288_p2 = pnand %p3287_p0, %p3281_p10 }
  0xa7   : > { %3291 = shalt.err (!%p3288_p2)
}
  0xa8   : > { %s3917_s30 = smov 128   ;;  %p3918_p8 = scmp.ne.s32.totalorder %s3908_s24, 0 }
  0xa9   : > { %3064 = dma.hbm_to_vmem [thread:$0]  (!%p3652_p11), %s3650_s11, 512, %s3656_s1, %s3658_s8, %s3917_s30, %s3917_s30, %s3376_s12  }
  0xaa   : > { %414 = sbr.rel (%p3918_p8) target bundleno = 1446 (0x5a6), region = 64  ;;  %s3692_s26 = sand.u32 (!%p3918_p8), 1, %s3362_s18  }
  0xab   : > { %s1993_s29 = sshll.u32 (!%p3918_p8), %s3692_s26, 5  ;;  %s417_s15 = scalar_lea.sflag (!%p3918_p8), [#allocation3], %s3692_s26 }
  0xac   : > { %s3698_s27 = scalar_lea.vmem (!%p3918_p8), [#allocation2], %s1993_s29 }
  0xb1   : > { %3337 = dma.done.wait (%p3632_p7), %s417_s15, 512  }
  0xb2   : > { %3339 = vsyncadd (%p3632_p7), %s417_s15, 4294966784  ;;  %p3919_p6 = scmp.eq.s32.totalorder %s3464_s23, 0 }
  0xb4   : > { %3341 = dma.done.wait (%p3919_p6), [#allocation6], 8192   ;;  %p3920_p10 = pmov %p3919_p6 }
  0xb5   : > { %p3921_p11 = pmov %p3919_p6 }
  0xb6   : > { %3343 = vsyncadd (%p3920_p10), [#allocation6], 4294959104 }
  0xb7   : > { %3345 = dma.done.wait (%p3921_p11), [#allocation9], 12288   ;;  %p3922_p3 = pmov %p3919_p6 }
  0xb9   : > { %3347 = vsyncadd (%p3922_p3), [#allocation9], 4294955008  ;;  %p3923_p5 = pmov %p3922_p3 }
  0xba   : > { %p3924_p9 = pmov %p3922_p3 }
  0xbb   : > { %3349 = dma.done.wait (%p3923_p5), [#allocation12], 2048  }
  0xbc   : > { %3351 = vsyncadd (%p3924_p9), [#allocation12], 4294965248  ;;  %v485_v0 = vld [vmem:[#allocation5] sm:$0xff]  ;;  %v486_v1 = vld [vmem:[#allocation5 + $0x8] sm:$0xff]  ;;  %s3933_s22 = sld [smem:[#allocation20_spill]]  ;;  %s478_s30 = scalar_lea.vmem [#allocation13], %s1993_s29 }
  0xbd   : > { %v487_v2 = vld [vmem:[#allocation5 + $0x10] sm:$0xff]  ;;  %v2653_v3 = vpack.c.bf16 %v486_v1, %v485_v0  ;;  %v488_v4 = vld [vmem:[#allocation5 + $0x18] sm:$0xff]  ;;  %v489_v6 = vld [vmem:[#allocation5 + $0x20] sm:$0xff]  ;;  %s1859_s15 = sshll.u32 %s478_s30, 4  ;;  %s3934_s12 = sld [smem:[#allocation21_spill]]  ;;  %s3838_s15 = int_to_ptr.vmem [resolvable:$true] %s1859_s15 }
  0xbe   : > { %v2657_v5 = vpack.c.bf16 %v488_v4, %v487_v2  ;;  %v490_v7 = vld [vmem:[#allocation5 + $0x28] sm:$0xff]  ;;  %v481_v9 = vld [vmem:[%s3698_s27] sm:$0xff]  ;;  %v491_v10 = vld [vmem:[#allocation5 + $0x30] sm:$0xff]  ;;  %s2014_s13 = sshll.u32 %s3464_s23, 9  ;;  %s3935_s1 = sld [smem:[#allocation22_spill]] }
  0xbf   : > { %2654 = vmatprep.subr.bf16.mxu0 %v2653_v3  ;;  %v2661_v8 = vpack.c.bf16 %v490_v7, %v489_v6  ;;  %v492_v11 = vld [vmem:[#allocation5 + $0x38] sm:$0xff]  ;;  %2267 = vmatprep.mubr.f32.mxu0 %v481_v9  ;;  %v687_v12 = vld [vmem:[#allocation7] sm:$0xff]  ;;  %v688_v13 = vld [vmem:[#allocation7 + $0x8] sm:$0xff]  ;;  %s1845_s23 = scalar_lea.sflag [#allocation4], %s3692_s26  ;;  %s3292_s25 = scalar_lea.vmem %s3838_s15, 512 }
  0xc0   : > { %2656 = vmatpush3.bf16.msra.mxu0 %v2653_v3  ;;  %v2685_v14 = vpack.c.bf16 %v688_v13, %v687_v12  ;;  %v689_v15 = vld [vmem:[#allocation7 + $0x10] sm:$0xff]  ;;  %v690_v16 = vld [vmem:[#allocation7 + $0x18] sm:$0xff]  ;;  %v2665_v17 = vpack.c.bf16 %v492_v11, %v491_v10  ;;  %v691_v19 = vld [vmem:[#allocation7 + $0x20] sm:$0xff]  ;;  %p3293_p7 = scmp.ne.s32.totalorder %s3838_s15, %s3292_s25  ;;  %p3936_p4 = scmp.ne.s32.totalorder %s3914_s14, 0 }
  0xc1   : > { %2658 = vmatprep.subr.bf16.mxu0 %v2657_v5  ;;  %v2689_v18 = vpack.c.bf16 %v690_v16, %v689_v15  ;;  %v692_v20 = vld [vmem:[#allocation7 + $0x28] sm:$0xff]  ;;  %v493_v21 = vld [vmem:[#allocation5 + $0x40] sm:$0xff]  ;;  %v693_v25 = vld [vmem:[#allocation7 + $0x30] sm:$0xff]  ;;  %s3380_s28 = smov [#allocation13]  }
  0xc2   : > { %v494_v22 = vld [vmem:[#allocation5 + $0x48] sm:$0xff]  ;;  %2686 = vmatprep.subr.bf16.mxu1 %v2685_v14  ;;  %v2693_v23 = vpack.c.bf16 %v692_v20, %v691_v19  ;;  %v694_v26 = vld [vmem:[#allocation7 + $0x38] sm:$0xff]  ;;  %v495_v27 = vld [vmem:[#allocation5 + $0x50] sm:$0xff]  ;;  %p3294_p12 = pnand %p3293_p7, %p3936_p4 }
  0xc3   : > { %2688 = vmatpush3.bf16.msra.mxu1 %v2685_v14  ;;  %v2669_v24 = vpack.c.bf16 %v494_v22, %v493_v21  ;;  %v496_v28 = vld [vmem:[#allocation5 + $0x58] sm:$0xff]  ;;  %v2697_v29 = vpack.c.bf16 %v694_v26, %v693_v25  ;;  %v695_v31 = vld [vmem:[#allocation7 + $0x40] sm:$0xff]  ;;  %v696_v32 = vld [vmem:[#allocation7 + $0x48] sm:$0xff] }
  0xc4   : > { %2660 = vmatpush3.bf16.msra.mxu0 %v2657_v5  ;;  %2690 = vmatprep.subr.bf16.mxu1 %v2689_v18  ;;  %v2673_v30 = vpack.c.bf16 %v496_v28, %v495_v27  ;;  %v497_v33 = vld [vmem:[#allocation5 + $0x60] sm:$0xff]  ;;  %v498_v34 = vld [vmem:[#allocation5 + $0x68] sm:$0xff]  ;;  %v2701_v35 = vpack.c.bf16 %v696_v32, %v695_v31  ;;  %v697_v37 = vld [vmem:[#allocation7 + $0x50] sm:$0xff]  ;;  %s3843_s8 = scalar_lea.hbm %s3935_s1, %s2014_s13  ;;  %p3295_p1 = pneg %p3294_p12 }
  0xc5   : > { %2662 = vmatprep.subr.bf16.mxu0 %v2661_v8  ;;  %v2677_v36 = vpack.c.bf16 %v498_v34, %v497_v33  ;;  %v698_v38 = vld [vmem:[#allocation7 + $0x58] sm:$0xff]  ;;  %v499_v39 = vld [vmem:[#allocation5 + $0x70] sm:$0xff]  ;;  %v699_v43 = vld [vmem:[#allocation7 + $0x60] sm:$0xff] }
  0xc6   : > { %v500_v40 = vld [vmem:[#allocation5 + $0x78] sm:$0xff]  ;;  %v2705_v41 = vpack.c.bf16 %v698_v38, %v697_v37  ;;  %v700_v44 = vld [vmem:[#allocation7 + $0x68] sm:$0xff]  ;;  %v671_v45 = vld [vmem:[#allocation7 + $0x80] sm:$0xff] }
  0xc7   : > { %2692 = vmatpush3.bf16.msra.mxu1 %v2689_v18  ;;  %v2681_v42 = vpack.c.bf16 %v500_v40, %v499_v39  ;;  %v672_v46 = vld [vmem:[#allocation7 + $0x88] sm:$0xff]  ;;  %v2709_v47 = vpack.c.bf16 %v700_v44, %v699_v43  ;;  %v673_v49 = vld [vmem:[#allocation7 + $0x90] sm:$0xff]  ;;  %v674_v50 = vld [vmem:[#allocation7 + $0x98] sm:$0xff] }
  0xc8   : > { %2664 = vmatpush3.bf16.msra.mxu0 %v2661_v8  ;;  %2694 = vmatprep.subr.bf16.mxu1 %v2693_v23  ;;  %v2717_v48 = vpack.c.bf16 %v672_v46, %v671_v45  ;;  %v482_v51 = vld [vmem:[%s3698_s27 + $0x8] sm:$0xff]  ;;  %v483_v52 = vld [vmem:[%s3698_s27 + $0x10] sm:$0xff]  ;;  %v2721_v53 = vpack.c.bf16 %v674_v50, %v673_v49  ;;  %v675_v54 = vld [vmem:[#allocation7 + $0xa0] sm:$0xff] }
  0xc9   : > { %2666 = vmatprep.subr.bf16.mxu0 %v2665_v17  ;;  %v676_v55 = vld [vmem:[#allocation7 + $0xa8] sm:$0xff]  ;;  %v484_v56 = vld [vmem:[%s3698_s27 + $0x18] sm:$0xff]  ;;  %v677_v58 = vld [vmem:[#allocation7 + $0xb0] sm:$0xff] }
  0xca   : > { %v2725_v57 = vpack.c.bf16 %v676_v55, %v675_v54  ;;  %v678_v59 = vld [vmem:[#allocation7 + $0xb8] sm:$0xff]  ;;  %v679_v61 = vld [vmem:[#allocation7 + $0xc0] sm:$0xff]  ;;  %v680_v62 = vld [vmem:[#allocation7 + $0xc8] sm:$0xff] }
  0xcb   : > { %2696 = vmatpush3.bf16.msra.mxu1 %v2693_v23  ;;  %v2729_v60 = vpack.c.bf16 %v678_v59, %v677_v58  ;;  %v2733_v63 = vpack.c.bf16 %v680_v62, %v679_v61  ;;  %v681_v0 = vld [vmem:[#allocation7 + $0xd0] sm:$0xff]  ;;  %v682_v1 = vld [vmem:[#allocation7 + $0xd8] sm:$0xff]  ;;  %v683_v3 = vld [vmem:[#allocation7 + $0xe0] sm:$0xff] }
  0xcc   : > { %2668 = vmatpush3.bf16.msra.mxu0 %v2665_v17  ;;  %2698 = vmatprep.subr.bf16.mxu1 %v2697_v29  ;;  %v2737_v2 = vpack.c.bf16 %v682_v1, %v681_v0  ;;  %v684_v4 = vld [vmem:[#allocation7 + $0xe8] sm:$0xff]  ;;  %v701_v6 = vld [vmem:[#allocation7 + $0x70] sm:$0xff]  ;;  %v702_v7 = vld [vmem:[#allocation7 + $0x78] sm:$0xff] }
  0xcd   : > { %2670 = vmatprep.subr.bf16.mxu0 %v2669_v24  ;;  %v2741_v5 = vpack.c.bf16 %v684_v4, %v683_v3  ;;  %v2713_v8 = vpack.c.bf16 %v702_v7, %v701_v6  ;;  %v685_v9 = vld [vmem:[#allocation7 + $0xf0] sm:$0xff]  ;;  %v686_v10 = vld [vmem:[#allocation7 + $0xf8] sm:$0xff]  ;;  %v895_v12 = vld [vmem:[#allocation7 + $0x100] sm:$0xff] }
  0xce   : > { %v2745_v11 = vpack.c.bf16 %v686_v10, %v685_v9  ;;  %v896_v13 = vld [vmem:[#allocation7 + $0x108] sm:$0xff]  ;;  %v2000_v15 = vld [vmem:[%s3889_s2] ss:$0 sm:$0xff]  ;;  %v897_v17 = vld [vmem:[#allocation7 + $0x110] sm:$0xff] }
  0xcf   : > { %2700 = vmatpush3.bf16.msra.mxu1 %v2697_v29  ;;  %v2749_v14 = vpack.c.bf16 %v896_v13, %v895_v12  ;;  %v898_v18 = vld [vmem:[#allocation7 + $0x118] sm:$0xff]  ;;  %v900_v25 = vld [vmem:[#allocation7 + $0x128] sm:$0xff]  ;;  %v903_v33 = vld [vmem:[#allocation7 + $0x140] sm:$0xff] }
  0xd0   : > { %2672 = vmatpush3.bf16.msra.mxu0 %v2669_v24  ;;  %2702 = vmatprep.subr.bf16.mxu1 %v2701_v35  ;;  %v2753_v22 = vpack.c.bf16 %v898_v18, %v897_v17  ;;  %v899_v24 = vld [vmem:[#allocation7 + $0x120] sm:$0xff]  ;;  %v902_v31 = vld [vmem:[#allocation7 + $0x138] sm:$0xff]  ;;  %v904_v34 = vld [vmem:[#allocation7 + $0x148] sm:$0xff] }
  0xd1   : > { %2674 = vmatprep.subr.bf16.mxu0 %v2673_v30  ;;  %v2757_v29 = vpack.c.bf16 %v900_v25, %v899_v24  ;;  %v906_v37 = vld [vmem:[#allocation7 + $0x158] sm:$0xff]  ;;  %v907_v39 = vld [vmem:[#allocation7 + $0x160] sm:$0xff]  ;;  %v908_v40 = vld [vmem:[#allocation7 + $0x168] sm:$0xff] }
  0xd2   : > { %v910_v43 = vld [vmem:[#allocation7 + $0x178] sm:$0xff]  ;;  %v1053_v45 = vld [vmem:[#allocation8] sm:$0xff]  ;;  %v1054_v46 = vld [vmem:[#allocation8 + $0x8] sm:$0xff] }
  0xd3   : > { %2704 = vmatpush3.bf16.msra.mxu1 %v2701_v35  ;;  %v2765_v35 = vpack.c.bf16 %v904_v34, %v903_v33  ;;  %v1038_v49 = vld [vmem:[#allocation8 + $0x88] sm:$0xff]  ;;  %v1055_v50 = vld [vmem:[#allocation8 + $0x10] sm:$0xff]  ;;  %v1040_v55 = vld [vmem:[#allocation8 + $0x98] sm:$0xff] }
  0xd4   : > { %2676 = vmatpush3.bf16.msra.mxu0 %v2673_v30  ;;  %2706 = vmatprep.subr.bf16.mxu1 %v2705_v41  ;;  %v901_v30 = vld [vmem:[#allocation7 + $0x130] sm:$0xff]  ;;  %v1058_v58 = vld [vmem:[#allocation8 + $0x28] sm:$0xff]  ;;  %v1041_v59 = vld [vmem:[#allocation8 + $0xa0] sm:$0xff] }
  0xd5   : > { %2678 = vmatprep.subr.bf16.mxu0 %v2677_v36  ;;  %v2761_v32 = vpack.c.bf16 %v902_v31, %v901_v30  ;;  %v1039_v54 = vld [vmem:[#allocation8 + $0x90] sm:$0xff]  ;;  %v1060_v0 = vld [vmem:[#allocation8 + $0x38] sm:$0xff]  ;;  %v1062_v6 = vld [vmem:[#allocation8 + $0x48] sm:$0xff] }
  0xd6   : > { %v1043_v1 = vld [vmem:[#allocation8 + $0xb0] sm:$0xff]  ;;  %v1046_v9 = vld [vmem:[#allocation8 + $0xc8] sm:$0xff]  ;;  %v1064_v12 = vld [vmem:[#allocation8 + $0x58] sm:$0xff] }
  0xd7   : > { %2708 = vmatpush3.bf16.msra.mxu1 %v2705_v41  ;;  %v2773_v41 = vpack.c.bf16 %v908_v40, %v907_v39  ;;  %v1065_v17 = vld [vmem:[#allocation8 + $0x60] sm:$0xff]  ;;  %v1066_v18 = vld [vmem:[#allocation8 + $0x68] sm:$0xff]  ;;  %v1068_v24 = vld [vmem:[#allocation8 + $0x78] sm:$0xff] }
  0xd8   : > { %2680 = vmatpush3.bf16.msra.mxu0 %v2677_v36  ;;  %2710 = vmatprep.subr.bf16.mxu1 %v2709_v47  ;;  %v905_v36 = vld [vmem:[#allocation7 + $0x150] sm:$0xff]  ;;  %v1253_v30 = vld [vmem:[#allocation8 + $0x108] sm:$0xff] }
  0xd9   : > { %2682 = vmatprep.subr.bf16.mxu0 %v2681_v42  ;;  %v2769_v38 = vpack.c.bf16 %v906_v37, %v905_v36 }
  0xdb   : > { %2712 = vmatpush3.bf16.msra.mxu1 %v2709_v47  ;;  %v1037_v47 = vld [vmem:[#allocation8 + $0x80] sm:$0xff] }
  0xdc   : > { %2684 = vmatpush3.bf16.msra.mxu0 %v2681_v42  ;;  %2714 = vmatprep.subr.bf16.mxu1 %v2713_v8  ;;  %v909_v42 = vld [vmem:[#allocation7 + $0x170] sm:$0xff] }
  0xdd   : > { %2718 = vmatprep.subr.bf16.mxu0 %v2717_v48  ;;  %v2777_v44 = vpack.c.bf16 %v910_v43, %v909_v42 }
  0xdf   : > { %2268 = vmatmul.mubr.f32.vlgmr.msra.gmra.mrb[0].mxu0 %v482_v51  ;;  %2716 = vmatpush3.bf16.msra.mxu1 %v2713_v8  ;;  %v1056_v51 = vld [vmem:[#allocation8 + $0x18] sm:$0xff]  ;;  %v1045_v8 = vld [vmem:[#allocation8 + $0xc0] sm:$0xff] }
  0xe0   : > { %2270 = vmatprep.mubr.f32.mxu0 %v483_v52  ;;  %2720 = vmatpush3.bf16.msra.mxu0 %v2717_v48  ;;  %v2781_v48 = vpack.c.bf16 %v1054_v46, %v1053_v45  ;;  %v2813_v52 = vpack.c.bf16 %v1038_v49, %v1037_v47  ;;  %v2829_v10 = vpack.c.bf16 %v1046_v9, %v1045_v8 }
  0xe1   : > { %2722 = vmatprep.subr.bf16.mxu0 %v2721_v53  ;;  %2750 = vmatprep.subr.bf16.mxu1 %v2749_v14 }
  0xe3   : > { %2271 = vmatmul.mubr.f32.gmra.mrb[2].mxu0 %v484_v56  ;;  %v1057_v56 = vld [vmem:[#allocation8 + $0x20] sm:$0xff] }
  0xe4   : > { %2724 = vmatpush3.bf16.msra.mxu0 %v2721_v53  ;;  %v2785_v53 = vpack.c.bf16 %v1056_v51, %v1055_v50  ;;  %v2789_v61 = vpack.c.bf16 %v1058_v58, %v1057_v56 }
  0xe5   : > { %2726 = vmatprep.subr.bf16.mxu0 %v2725_v57 }
  0xe8   : > { %2728 = vmatpush3.bf16.msra.mxu0 %v2725_v57  ;;  %v2817_v57 = vpack.c.bf16 %v1040_v55, %v1039_v54 }
  0xe9   : > { %2730 = vmatprep.subr.bf16.mxu0 %v2729_v60 }
  0xec   : > { %2732 = vmatpush3.bf16.msra.mxu0 %v2729_v60  ;;  %v1042_v60 = vld [vmem:[#allocation8 + $0xa8] sm:$0xff] }
  0xed   : > { %2734 = vmatprep.subr.bf16.mxu0 %v2733_v63  ;;  %v2821_v62 = vpack.c.bf16 %v1042_v60, %v1041_v59 }
  0xf0   : > { %2736 = vmatpush3.bf16.msra.mxu0 %v2733_v63  ;;  %v1059_v63 = vld [vmem:[#allocation8 + $0x30] sm:$0xff] }
  0xf1   : > { %2738 = vmatprep.subr.bf16.mxu0 %v2737_v2  ;;  %v2793_v3 = vpack.c.bf16 %v1060_v0, %v1059_v63 }
  0xf4   : > { %2740 = vmatpush3.bf16.msra.mxu0 %v2737_v2  ;;  %v1044_v2 = vld [vmem:[#allocation8 + $0xb8] sm:$0xff] }
  0xf5   : > { %2742 = vmatprep.subr.bf16.mxu0 %v2741_v5  ;;  %v2825_v4 = vpack.c.bf16 %v1044_v2, %v1043_v1 }
  0xf8   : > { %2744 = vmatpush3.bf16.msra.mxu0 %v2741_v5  ;;  %v1061_v5 = vld [vmem:[#allocation8 + $0x40] sm:$0xff] }
  0xf9   : > { %2746 = vmatprep.subr.bf16.mxu0 %v2745_v11  ;;  %v2797_v7 = vpack.c.bf16 %v1062_v6, %v1061_v5 }
  0xfc   : > { %2748 = vmatpush3.bf16.msra.mxu0 %v2745_v11  ;;  %v1063_v11 = vld [vmem:[#allocation8 + $0x50] sm:$0xff] }
  0xfd   : > { %2782 = vmatprep.subr.bf16.mxu0 %v2781_v48  ;;  %v2801_v13 = vpack.c.bf16 %v1064_v12, %v1063_v11 }
 0x1b2   : > { %v2269_v16 = vpop.f32.mrb[0].mxu0 }
 0x1b3   : > { %v574_v19 = vpop.f32.mrb[1].mxu0  ;;  %v580_v21 = vadd.f32 %v2269_v16, %v2000_v15 }
 0x1b4   : > { %v575_v20 = vadd.f32 %v2000_v15, %v574_v19  ;;  %v2805_v19 = vpack.c.bf16 %v1066_v18, %v1065_v17 }
 0x1b6   : > { %v2272_v23 = vpop.f32.mrb[2].mxu0  ;;  %2305 = vmatprep.mubr.f32.mxu1 %v575_v20  ;;  %2343 = vmatprep.mubr.f32.mxu0 %v575_v20 }
 0x1b7   : > { %v590_v26 = vadd.f32 %v2272_v23, %v2000_v15  ;;  %v584_v27 = vpop.f32.mrb[3].mxu0  ;;  %2306 = vmatmul.mubr.f32.vlgmr.msra.gmra.mrb[0].mxu1 %v580_v21  ;;  %2344 = vmatmul.mubr.f32.vlgmr.msra.gmra.mrb[4].mxu0 %v580_v21  ;;  %v1067_v23 = vld [vmem:[#allocation8 + $0x70] sm:$0xff] }
 0x1b8   : > { %v585_v28 = vadd.f32 %v2000_v15, %v584_v27  ;;  %2752 = vmatpush3.bf16.msra.mxu1 %v2749_v14  ;;  %2784 = vmatpush3.bf16.msra.mxu0 %v2781_v48  ;;  %v1047_v14 = vld [vmem:[#allocation8 + $0xd0] sm:$0xff]  ;;  %v1048_v15 = vld [vmem:[#allocation8 + $0xd8] sm:$0xff]  ;;  %v2809_v25 = vpack.c.bf16 %v1068_v24, %v1067_v23 }
 0x1b9   : > { %2754 = vmatprep.subr.bf16.mxu1 %v2753_v22  ;;  %2786 = vmatprep.subr.bf16.mxu0 %v2785_v53  ;;  %v2833_v16 = vpack.c.bf16 %v1048_v15, %v1047_v14  ;;  %v1052_v27 = vld [vmem:[#allocation8 + $0xf8] sm:$0xff] }
 0x1ba   : > { %2308 = vmatprep.mubr.f32.mxu1 %v585_v28  ;;  %2346 = vmatprep.mubr.f32.mxu0 %v585_v28 }
 0x1bb   : > { %2309 = vmatmul.mubr.f32.gmra.mrb[2].mxu1 %v590_v26  ;;  %2347 = vmatmul.mubr.f32.gmra.mrb[6].mxu0 %v590_v26 }
 0x1bc   : > { %2756 = vmatpush3.bf16.msra.mxu1 %v2753_v22  ;;  %2381 = vmatprep.mubr.f32.mxu1 %v575_v20  ;;  %v1049_v20 = vld [vmem:[#allocation8 + $0xe0] sm:$0xff] }
 0x1bd   : > { %2758 = vmatprep.subr.bf16.mxu1 %v2757_v29  ;;  %2788 = vmatpush3.bf16.msra.mxu0 %v2785_v53 }
 0x1be   : > { %2790 = vmatprep.subr.bf16.mxu0 %v2789_v61 }
 0x1c0   : > { %2760 = vmatpush3.bf16.msra.mxu1 %v2757_v29  ;;  %v1252_v29 = vld [vmem:[#allocation8 + $0x100] sm:$0xff] }
 0x1c1   : > { %2762 = vmatprep.subr.bf16.mxu1 %v2761_v32  ;;  %2792 = vmatpush3.bf16.msra.mxu0 %v2789_v61  ;;  %v3723_v31 = vpack.c.bf16 %v1253_v30, %v1252_v29 }
 0x1c2   : > { %2794 = vmatprep.subr.bf16.mxu0 %v2793_v3 }
 0x1c4   : > { %2764 = vmatpush3.bf16.msra.mxu1 %v2761_v32  ;;  %v593_v32 = vlaneseq }
 0x1c5   : > { %2766 = vmatprep.subr.bf16.mxu1 %v2765_v35  ;;  %2796 = vmatpush3.bf16.msra.mxu0 %v2793_v3 }
 0x1c6   : > { %2798 = vmatprep.subr.bf16.mxu0 %v2797_v7  ;;  %v3726_v33 = vshrl.u32 %v593_v32, 7 }
 0x1c8   : > { %2768 = vmatpush3.bf16.msra.mxu1 %v2765_v35  ;;  %v596_v34 = vadd.s32 16, %v3726_v33  ;;  %vm792_vm0 = vcmp.lt.s32.totalorder %v3726_v33, 1  ;;  %v602_v40 = vand.u32 15, %v3726_v33  ;;  %v597_v61 = vadd.s32 24, %v3726_v33 }
 0x1c9   : > { %2770 = vmatprep.subr.bf16.mxu1 %v2769_v38  ;;  %2800 = vmatpush3.bf16.msra.mxu0 %v2797_v7  ;;  %vm1000_vm3 = vcmp.lt.s32.totalorder %v3726_v33, 7  ;;  %v2001_v7 = vld [vmem:[%s3891_s4] ss:$0 sm:$0xff] }
 0x1ca   : > { %2802 = vmatprep.subr.bf16.mxu0 %v2801_v13  ;;  %v616_v42 = vand.u32 15, %v596_v34  ;;  %vm3733_vm1 = vcmp.ge.s32.totalorder %v602_v40, 1  ;;  %v623_v2 = vand.u32 15, %v597_v61  ;;  %v1256_v34 = vld [vmem:[#allocation8 + $0x120] sm:$0xff] }
 0x1cc   : > { %2772 = vmatpush3.bf16.msra.mxu1 %v2769_v38  ;;  %vm3737_vm2 = vcmp.ge.s32.totalorder %v616_v42, 1  ;;  %vm3759_vm4 = vcmp.lt.s32.totalorder %v623_v2, 15  ;;  %v1261_v42 = vld [vmem:[#allocation8 + $0x148] sm:$0xff] }
 0x1cd   : > { %2774 = vmatprep.subr.bf16.mxu1 %v2773_v41  ;;  %2804 = vmatpush3.bf16.msra.mxu0 %v2801_v13 }
 0x1ce   : > { %2806 = vmatprep.subr.bf16.mxu0 %v2805_v19 }
 0x1d0   : > { %2776 = vmatpush3.bf16.msra.mxu1 %v2773_v41 }
 0x1d1   : > { %2778 = vmatprep.subr.bf16.mxu1 %v2777_v44  ;;  %2808 = vmatpush3.bf16.msra.mxu0 %v2805_v19 }
 0x1d2   : > { %2810 = vmatprep.subr.bf16.mxu0 %v2809_v25 }
 0x1d4   : > { %2780 = vmatpush3.bf16.msra.mxu1 %v2777_v44 }
 0x1d5   : > { %2814 = vmatprep.subr.bf16.mxu1 %v2813_v52  ;;  %2812 = vmatpush3.bf16.msra.mxu0 %v2809_v25  ;;  %v1254_v25 = vld [vmem:[#allocation8 + $0x110] sm:$0xff] }
 0x1d6   : > { %2846 = vmatprep.subr.bf16.mxu0 %v3723_v31 }
 0x1d7   : > { %2382 = vmatmul.mubr.f32.vlgmr.msra.gmra.mrb[4].mxu1 %v580_v21  ;;  %v1050_v21 = vld [vmem:[#allocation8 + $0xe8] sm:$0xff] }
 0x1d8   : > { %2384 = vmatprep.mubr.f32.mxu1 %v585_v28  ;;  %2816 = vmatpush3.bf16.msra.mxu1 %v2813_v52  ;;  %v2837_v22 = vpack.c.bf16 %v1050_v21, %v1049_v20 }
 0x1d9   : > { %2818 = vmatprep.subr.bf16.mxu1 %v2817_v57 }
 0x1db   : > { %2385 = vmatmul.mubr.f32.gmra.mrb[6].mxu1 %v590_v26  ;;  %v1051_v26 = vld [vmem:[#allocation8 + $0xf0] sm:$0xff] }
 0x1dc   : > { %2820 = vmatpush3.bf16.msra.mxu1 %v2817_v57  ;;  %v2841_v28 = vpack.c.bf16 %v1052_v27, %v1051_v26  ;;  %v1255_v26 = vld [vmem:[#allocation8 + $0x118] sm:$0xff] }
 0x1dd   : > { %2822 = vmatprep.subr.bf16.mxu1 %v2821_v62  ;;  %v2849_v29 = vpack.c.bf16 %v1255_v26, %v1254_v25  ;;  %v1395_v25 = vld [vmem:[#allocation10 + $0xd0] sm:$0xff]  ;;  %v1396_v26 = vld [vmem:[#allocation10 + $0xd8] sm:$0xff] }
 0x1e0   : > { %2824 = vmatpush3.bf16.msra.mxu1 %v2821_v62  ;;  %v595_v62 = vadd.s32 8, %v3726_v33  ;;  %v2004_v33 = vld [vmem:[%s3934_s12] ss:$0 sm:$0xff] }
 0x1e1   : > { %2826 = vmatprep.subr.bf16.mxu1 %v2825_v4 }
 0x1e4   : > { %2828 = vmatpush3.bf16.msra.mxu1 %v2825_v4  ;;  %v609_v4 = vand.u32 15, %v595_v62 }
 0x1e5   : > { %2830 = vmatprep.subr.bf16.mxu1 %v2829_v10 }
 0x1e6   : > { %vm3763_vm5 = vcmp.lt.s32.totalorder %v609_v4, 15  ;;  %v1389_v4 = vld [vmem:[#allocation10 + $0xa0] sm:$0xff] }
 0x1e8   : > { %2832 = vmatpush3.bf16.msra.mxu1 %v2829_v10 }
 0x1e9   : > { %2834 = vmatprep.subr.bf16.mxu1 %v2833_v16 }
 0x1ec   : > { %2836 = vmatpush3.bf16.msra.mxu1 %v2833_v16 }
 0x1ed   : > { %2838 = vmatprep.subr.bf16.mxu1 %v2837_v22 }
 0x1f0   : > { %2840 = vmatpush3.bf16.msra.mxu1 %v2837_v22 }
 0x1f1   : > { %2842 = vmatprep.subr.bf16.mxu1 %v2841_v28 }
 0x1f4   : > { %2844 = vmatpush3.bf16.msra.mxu1 %v2841_v28 }
 0x28a   : > { %v2307_v35 = vpop.f32.mrb[0].mxu1  ;;  %v2345_v36 = vpop.f32.mrb[4].mxu0 }
 0x28b   : > { %v789_v37 = vrot.slane %v2307_v35, 7  ;;  %v769_v38 = vpop.f32.mrb[1].mxu1  ;;  %v875_v39 = vpop.f32.mrb[5].mxu0  ;;  %v1257_v35 = vld [vmem:[#allocation8 + $0x128] sm:$0xff] }
 0x28c   : > { %v788_v41 = vrot.slane %v769_v38, 7  ;;  %v1258_v38 = vld [vmem:[#allocation8 + $0x130] sm:$0xff] }
 0x28e   : > { %v795_v43 = vsel %vm792_vm0, %v788_v41, %v789_v37  ;;  %v2310_v44 = vpop.f32.mrb[2].mxu1  ;;  %v2348_v45 = vpop.f32.mrb[6].mxu0 }
 0x28f   : > { %v881_v46 = vadd.f32 %v2345_v36, %v795_v43  ;;  %v791_v48 = vrot.slane %v2310_v44, 7  ;;  %v779_v49 = vpop.f32.mrb[3].mxu1  ;;  %v885_v50 = vpop.f32.mrb[7].mxu0  ;;  %v1262_v44 = vld [vmem:[#allocation8 + $0x150] sm:$0xff] }
 0x290   : > { %v790_v51 = vrot.slane %v779_v49, 7 }
 0x291   : > { %v796_v53 = vsel %vm792_vm0, %v791_v48, %v788_v41  ;;  %v1260_v41 = vld [vmem:[#allocation8 + $0x140] sm:$0xff] }
 0x292   : > { %v805_v54 = vsel %vm3733_vm1, %v796_v53, 0.0  ;;  %v793_v55 = vsel %vm792_vm0, %v790_v51, %v791_v48  ;;  %v794_v56 = vsel %vm792_vm0, %v789_v37, %v790_v51  ;;  %v2853_v37 = vpack.c.bf16 %v1257_v35, %v1256_v34  ;;  %v1265_v48 = vld [vmem:[#allocation8 + $0x168] sm:$0xff]  ;;  %v1267_v51 = vld [vmem:[#allocation8 + $0x178] sm:$0xff] }
 0x293   : > { %v876_v57 = vadd.f32 %v875_v39, %v805_v54  ;;  %v891_v58 = vadd.f32 %v2348_v45, %v793_v55  ;;  %v807_v59 = vsel %vm3737_vm2, %v794_v56, 0.0  ;;  %v1259_v39 = vld [vmem:[#allocation8 + $0x138] sm:$0xff]  ;;  %v2861_v43 = vpack.c.bf16 %v1261_v42, %v1260_v41  ;;  %v1401_v54 = vld [vmem:[#allocation10] sm:$0xff]  ;;  %v1402_v55 = vld [vmem:[#allocation10 + $0x8] sm:$0xff] }
 0x294   : > { %v886_v60 = vadd.f32 %v885_v50, %v807_v59  ;;  %v2857_v40 = vpack.c.bf16 %v1259_v39, %v1258_v38  ;;  %v1266_v50 = vld [vmem:[#allocation8 + $0x170] sm:$0xff]  ;;  %v1385_v56 = vld [vmem:[#allocation10 + $0x80] sm:$0xff]  ;;  %v1398_v34 = vld [vmem:[#allocation10 + $0xe8] sm:$0xff] }
 0x295   : > { %v2873_v53 = vpack.c.bf16 %v1267_v51, %v1266_v50  ;;  %v1403_v59 = vld [vmem:[#allocation10 + $0x10] sm:$0xff]  ;;  %v1600_v42 = vld [vmem:[#allocation10 + $0x100] sm:$0xff] }
 0x296   : > { %v1399_v39 = vld [vmem:[#allocation10 + $0xf0] sm:$0xff] }
 0x2aa   : > { %v2383_v63 = vpop.f32.mrb[4].mxu1 }
 0x2ab   : > { %v997_v0 = vrot.slane %v2383_v63, 1  ;;  %v977_v1 = vpop.f32.mrb[5].mxu1  ;;  %v1387_v63 = vld [vmem:[#allocation10 + $0x90] sm:$0xff] }
 0x2ac   : > { %v996_v3 = vrot.slane %v977_v1, 1  ;;  %v1405_v1 = vld [vmem:[#allocation10 + $0x20] sm:$0xff] }
 0x2ae   : > { %v1003_v5 = vsel %vm1000_vm3, %v996_v3, %v997_v0  ;;  %v2386_v6 = vpop.f32.mrb[6].mxu1 }
 0x2af   : > { %v1017_v8 = vadd.f32 %v1003_v5, %v876_v57  ;;  %v999_v10 = vrot.slane %v2386_v6, 1  ;;  %v987_v11 = vpop.f32.mrb[7].mxu1  ;;  %v2877_v57 = vpack.c.bf16 %v1402_v55, %v1401_v54  ;;  %v1390_v5 = vld [vmem:[#allocation10 + $0xa8] sm:$0xff] }
 0x2b0   : > { %v998_v13 = vrot.slane %v987_v11, 1  ;;  %v1391_v11 = vld [vmem:[#allocation10 + $0xb0] sm:$0xff] }
 0x2b1   : > { %v1004_v14 = vsel %vm1000_vm3, %v999_v10, %v996_v3  ;;  %v1028_v15 = vadd.f32 %v2001_v7, %v1017_v8  ;;  %2878 = vmatprep.subr.bf16.mxu1 %v2877_v57  ;;  %v1406_v3 = vld [vmem:[#allocation10 + $0x28] sm:$0xff]  ;;  %v1407_v8 = vld [vmem:[#allocation10 + $0x30] sm:$0xff] }
 0x2b2   : > { %v1016_v16 = vsel %vm3759_vm4, %v1004_v14, 0.0  ;;  %v1001_v17 = vsel %vm1000_vm3, %v998_v13, %v999_v10  ;;  %v1002_v18 = vsel %vm1000_vm3, %v997_v0, %v998_v13  ;;  %v1388_v0 = vld [vmem:[#allocation10 + $0x98] sm:$0xff]  ;;  %v2885_v6 = vpack.c.bf16 %v1406_v3, %v1405_v1 }
 0x2b3   : > { %v1014_v19 = vsel %vm3763_vm5, %v1002_v18, 0.0  ;;  %v1019_v20 = vadd.f32 %v1001_v17, %v886_v60  ;;  %v1032_v21 = vmax.f32 %v1028_v15, 0.0  ;;  %v1020_v22 = vadd.f32 %v1016_v16, %v891_v58  ;;  %v1386_v58 = vld [vmem:[#allocation10 + $0x88] sm:$0xff]  ;;  %v1404_v60 = vld [vmem:[#allocation10 + $0x18] sm:$0xff]  ;;  %v1409_v16 = vld [vmem:[#allocation10 + $0x40] sm:$0xff] }
 0x2b4   : > { %v1018_v23 = vadd.f32 %v1014_v19, %v881_v46  ;;  %v1264_v46 = vld [vmem:[#allocation8 + $0x160] sm:$0xff]  ;;  %v2909_v61 = vpack.c.bf16 %v1386_v58, %v1385_v56  ;;  %v2881_v62 = vpack.c.bf16 %v1404_v60, %v1403_v59  ;;  %v2913_v2 = vpack.c.bf16 %v1388_v0, %v1387_v63  ;;  %v1408_v10 = vld [vmem:[#allocation10 + $0x38] sm:$0xff]  ;;  %v1410_v17 = vld [vmem:[#allocation10 + $0x48] sm:$0xff] }
 0x2b5   : > { %2419 = vmatprep.mubr.f32.mxu0 %v1032_v21  ;;  %2457 = vmatprep.mubr.f32.mxu1 %v1032_v21  ;;  %v1030_v24 = vadd.f32 %v2001_v7, %v1019_v20  ;;  %v1031_v30 = vadd.f32 %v2001_v7, %v1020_v22  ;;  %v2869_v49 = vpack.c.bf16 %v1265_v48, %v1264_v46  ;;  %v1392_v13 = vld [vmem:[#allocation10 + $0xb8] sm:$0xff]  ;;  %v1393_v19 = vld [vmem:[#allocation10 + $0xc0] sm:$0xff]  ;;  %v1394_v20 = vld [vmem:[#allocation10 + $0xc8] sm:$0xff] }
 0x2b6   : > { %v1029_v27 = vadd.f32 %v2001_v7, %v1018_v23  ;;  %v2917_v7 = vpack.c.bf16 %v1390_v5, %v1389_v4  ;;  %v2889_v14 = vpack.c.bf16 %v1408_v10, %v1407_v8  ;;  %v2921_v15 = vpack.c.bf16 %v1392_v13, %v1391_v11  ;;  %v1411_v22 = vld [vmem:[#allocation10 + $0x50] sm:$0xff]  ;;  %v1412_v23 = vld [vmem:[#allocation10 + $0x58] sm:$0xff]  ;;  %v2002_v11 = vld [vmem:[%s3893_s6] ss:$0 sm:$0xff] }
 0x2b7   : > { %v1034_v32 = vmax.f32 %v1030_v24, 0.0  ;;  %v1035_v36 = vmax.f32 %v1031_v30, 0.0  ;;  %v2893_v18 = vpack.c.bf16 %v1410_v17, %v1409_v16  ;;  %v2897_v24 = vpack.c.bf16 %v1412_v23, %v1411_v22 }
 0x2b8   : > { %v1033_v28 = vmax.f32 %v1029_v27, 0.0  ;;  %v2929_v27 = vpack.c.bf16 %v1396_v26, %v1395_v25 }
 0x2ba   : > { %2420 = vmatmul.mubr.f32.vlgmr.msra.gmra.mrb[8].mxu0 %v1033_v28  ;;  %2458 = vmatmul.mubr.f32.vlgmr.msra.gmra.mrb[8].mxu1 %v1033_v28 }
 0x2bb   : > { %2848 = vmatpush3.bf16.msra.mxu0 %v3723_v31  ;;  %2422 = vmatprep.mubr.f32.mxu0 %v1034_v32  ;;  %v1263_v31 = vld [vmem:[#allocation8 + $0x158] sm:$0xff] }
 0x2bc   : > { %2460 = vmatprep.mubr.f32.mxu1 %v1034_v32  ;;  %2850 = vmatprep.subr.bf16.mxu0 %v2849_v29  ;;  %v2865_v45 = vpack.c.bf16 %v1263_v31, %v1262_v44 }
 0x2bd   : > { %2880 = vmatpush3.bf16.msra.mxu1 %v2877_v57 }
 0x2be   : > { %2423 = vmatmul.mubr.f32.gmra.mrb[10].mxu0 %v1035_v36  ;;  %2461 = vmatmul.mubr.f32.gmra.mrb[10].mxu1 %v1035_v36 }
 0x2bf   : > { %2852 = vmatpush3.bf16.msra.mxu0 %v2849_v29  ;;  %2495 = vmatprep.mubr.f32.mxu0 %v1032_v21  ;;  %v2925_v21 = vpack.c.bf16 %v1394_v20, %v1393_v19  ;;  %v1414_v29 = vld [vmem:[#allocation10 + $0x68] sm:$0xff] }
 0x2c0   : > { %2854 = vmatprep.subr.bf16.mxu0 %v2853_v37  ;;  %2882 = vmatprep.subr.bf16.mxu1 %v2881_v62 }
 0x2c1   : > { %2884 = vmatpush3.bf16.msra.mxu1 %v2881_v62 }
 0x2c2   : > { %2886 = vmatprep.subr.bf16.mxu1 %v2885_v6 }
 0x2c3   : > { %2856 = vmatpush3.bf16.msra.mxu0 %v2853_v37  ;;  %v1416_v37 = vld [vmem:[#allocation10 + $0x78] sm:$0xff] }
 0x2c4   : > { %2858 = vmatprep.subr.bf16.mxu0 %v2857_v40 }
 0x2c5   : > { %2888 = vmatpush3.bf16.msra.mxu1 %v2885_v6 }
 0x2c6   : > { %2890 = vmatprep.subr.bf16.mxu1 %v2889_v14 }
 0x2c7   : > { %2860 = vmatpush3.bf16.msra.mxu0 %v2857_v40  ;;  %v1400_v40 = vld [vmem:[#allocation10 + $0xf8] sm:$0xff] }
 0x2c8   : > { %2862 = vmatprep.subr.bf16.mxu0 %v2861_v43  ;;  %v2937_v41 = vpack.c.bf16 %v1400_v40, %v1399_v39 }
 0x2c9   : > { %2892 = vmatpush3.bf16.msra.mxu1 %v2889_v14 }
 0x2ca   : > { %2894 = vmatprep.subr.bf16.mxu1 %v2893_v18 }
 0x2cb   : > { %2864 = vmatpush3.bf16.msra.mxu0 %v2861_v43  ;;  %v1601_v43 = vld [vmem:[#allocation10 + $0x108] sm:$0xff] }
 0x2cc   : > { %2866 = vmatprep.subr.bf16.mxu0 %v2865_v45  ;;  %v2941_v44 = vpack.c.bf16 %v1601_v43, %v1600_v42  ;;  %v1607_v42 = vld [vmem:[#allocation10 + $0x138] sm:$0xff] }
 0x2cd   : > { %2896 = vmatpush3.bf16.msra.mxu1 %v2893_v18 }
 0x2ce   : > { %2898 = vmatprep.subr.bf16.mxu1 %v2897_v24 }
 0x2cf   : > { %2868 = vmatpush3.bf16.msra.mxu0 %v2865_v45 }
 0x2d0   : > { %2870 = vmatprep.subr.bf16.mxu0 %v2869_v49 }
 0x2d1   : > { %2900 = vmatpush3.bf16.msra.mxu1 %v2897_v24 }
 0x2d3   : > { %2872 = vmatpush3.bf16.msra.mxu0 %v2869_v49 }
 0x2d4   : > { %2874 = vmatprep.subr.bf16.mxu0 %v2873_v53 }
 0x2d7   : > { %2876 = vmatpush3.bf16.msra.mxu0 %v2873_v53 }
 0x2d8   : > { %2910 = vmatprep.subr.bf16.mxu0 %v2909_v61 }
 0x2da   : > { %2496 = vmatmul.mubr.f32.vlgmr.msra.gmra.mrb[12].mxu0 %v1033_v28  ;;  %v1413_v28 = vld [vmem:[#allocation10 + $0x60] sm:$0xff] }
 0x2db   : > { %2498 = vmatprep.mubr.f32.mxu0 %v1034_v32  ;;  %2912 = vmatpush3.bf16.msra.mxu0 %v2909_v61  ;;  %v2901_v30 = vpack.c.bf16 %v1414_v29, %v1413_v28  ;;  %v1397_v32 = vld [vmem:[#allocation10 + $0xe0] sm:$0xff]  ;;  %v1602_v28 = vld [vmem:[#allocation10 + $0x110] sm:$0xff]  ;;  %v1603_v29 = vld [vmem:[#allocation10 + $0x118] sm:$0xff] }
 0x2dc   : > { %2914 = vmatprep.subr.bf16.mxu0 %v2913_v2  ;;  %v2933_v35 = vpack.c.bf16 %v1398_v34, %v1397_v32  ;;  %v2945_v34 = vpack.c.bf16 %v1603_v29, %v1602_v28 }
 0x2dd   : > { %2902 = vmatprep.subr.bf16.mxu1 %v2901_v30 }
 0x2de   : > { %2499 = vmatmul.mubr.f32.gmra.mrb[14].mxu0 %v1035_v36  ;;  %2904 = vmatpush3.bf16.msra.mxu1 %v2901_v30  ;;  %v1415_v36 = vld [vmem:[#allocation10 + $0x70] sm:$0xff] }
 0x2df   : > { %2916 = vmatpush3.bf16.msra.mxu0 %v2913_v2  ;;  %v2905_v38 = vpack.c.bf16 %v1416_v37, %v1415_v36  ;;  %v1604_v37 = vld [vmem:[#allocation10 + $0x120] sm:$0xff] }
 0x2e0   : > { %2918 = vmatprep.subr.bf16.mxu0 %v2917_v7 }
 0x2e1   : > { %2906 = vmatprep.subr.bf16.mxu1 %v2905_v38 }
 0x2e2   : > { %2908 = vmatpush3.bf16.msra.mxu1 %v2905_v38  ;;  %v1605_v38 = vld [vmem:[#allocation10 + $0x128] sm:$0xff] }
 0x2e3   : > { %2920 = vmatpush3.bf16.msra.mxu0 %v2917_v7  ;;  %2942 = vmatprep.subr.bf16.mxu1 %v2941_v44  ;;  %v2949_v40 = vpack.c.bf16 %v1605_v38, %v1604_v37 }
 0x2e4   : > { %2922 = vmatprep.subr.bf16.mxu0 %v2921_v15 }
 0x2e7   : > { %2924 = vmatpush3.bf16.msra.mxu0 %v2921_v15 }
 0x2e8   : > { %2926 = vmatprep.subr.bf16.mxu0 %v2925_v21 }
 0x2eb   : > { %2928 = vmatpush3.bf16.msra.mxu0 %v2925_v21 }
 0x2ec   : > { %2930 = vmatprep.subr.bf16.mxu0 %v2929_v27 }
 0x2ef   : > { %2932 = vmatpush3.bf16.msra.mxu0 %v2929_v27 }
 0x2f0   : > { %2934 = vmatprep.subr.bf16.mxu0 %v2933_v35 }
 0x2f3   : > { %2936 = vmatpush3.bf16.msra.mxu0 %v2933_v35 }
 0x2f4   : > { %2938 = vmatprep.subr.bf16.mxu0 %v2937_v41 }
 0x2f7   : > { %2940 = vmatpush3.bf16.msra.mxu0 %v2937_v41  ;;  %v1606_v41 = vld [vmem:[#allocation10 + $0x130] sm:$0xff] }
 0x2f8   : > { %v2953_v43 = vpack.c.bf16 %v1607_v42, %v1606_v41 }
 0x38d   : > { %v2421_v31 = vpop.f32.mrb[8].mxu0  ;;  %v2459_v45 = vpop.f32.mrb[8].mxu1 }
 0x38e   : > { %v1155_v46 = vrot.slane %v2421_v31, 7  ;;  %v1135_v48 = vpop.f32.mrb[9].mxu0  ;;  %v1232_v49 = vpop.f32.mrb[9].mxu1  ;;  %v1608_v31 = vld [vmem:[#allocation10 + $0x140] sm:$0xff] }
 0x38f   : > { %v1154_v50 = vrot.slane %v1135_v48, 7  ;;  %v1610_v48 = vld [vmem:[#allocation10 + $0x150] sm:$0xff] }
 0x391   : > { %v1160_v51 = vsel %vm792_vm0, %v1154_v50, %v1155_v46  ;;  %v2424_v53 = vpop.f32.mrb[10].mxu0  ;;  %v2462_v54 = vpop.f32.mrb[10].mxu1 }
 0x392   : > { %v1238_v55 = vadd.f32 %v2459_v45, %v1160_v51  ;;  %v1157_v56 = vrot.slane %v2424_v53, 7  ;;  %v1145_v57 = vpop.f32.mrb[11].mxu0  ;;  %v1242_v58 = vpop.f32.mrb[11].mxu1  ;;  %v1609_v45 = vld [vmem:[#allocation10 + $0x148] sm:$0xff] }
 0x393   : > { %v1156_v59 = vrot.slane %v1145_v57, 7  ;;  %v1613_v51 = vld [vmem:[#allocation10 + $0x168] sm:$0xff]  ;;  %v1732_v57 = vld [vmem:[#allocation11] sm:$0xff] }
 0x394   : > { %v1161_v60 = vsel %vm792_vm0, %v1157_v56, %v1154_v50  ;;  %v1612_v50 = vld [vmem:[#allocation10 + $0x160] sm:$0xff] }
 0x395   : > { %v1162_v61 = vsel %vm3733_vm1, %v1161_v60, 0.0  ;;  %v1158_v62 = vsel %vm792_vm0, %v1156_v59, %v1157_v56  ;;  %v1159_v63 = vsel %vm792_vm0, %v1155_v46, %v1156_v59  ;;  %v2957_v46 = vpack.c.bf16 %v1609_v45, %v1608_v31  ;;  %v1734_v59 = vld [vmem:[#allocation11 + $0x10] sm:$0xff] }
 0x396   : > { %v1233_v0 = vadd.f32 %v1232_v49, %v1162_v61  ;;  %v1248_v1 = vadd.f32 %v2462_v54, %v1158_v62  ;;  %v1164_v2 = vsel %vm3737_vm2, %v1159_v63, 0.0  ;;  %v2965_v53 = vpack.c.bf16 %v1613_v51, %v1612_v50  ;;  %v1614_v54 = vld [vmem:[#allocation10 + $0x170] sm:$0xff]  ;;  %v1735_v61 = vld [vmem:[#allocation11 + $0x18] sm:$0xff]  ;;  %v1736_v63 = vld [vmem:[#allocation11 + $0x20] sm:$0xff] }
 0x397   : > { %v1243_v3 = vadd.f32 %v1242_v58, %v1164_v2  ;;  %v1733_v58 = vld [vmem:[#allocation11 + $0x8] sm:$0xff]  ;;  %v2977_v62 = vpack.c.bf16 %v1735_v61, %v1734_v59  ;;  %v1738_v2 = vld [vmem:[#allocation11 + $0x30] sm:$0xff] }
 0x398   : > { %v2973_v60 = vpack.c.bf16 %v1733_v58, %v1732_v57 }
 0x39a   : > { %2974 = vmatprep.subr.bf16.mxu0 %v2973_v60 }
 0x3ad   : > { %v2497_v4 = vpop.f32.mrb[12].mxu0 }
 0x3ae   : > { %v1354_v5 = vrot.slane %v2497_v4, 1  ;;  %v1334_v6 = vpop.f32.mrb[13].mxu0 }
 0x3af   : > { %v1353_v7 = vrot.slane %v1334_v6, 1  ;;  %v1741_v6 = vld [vmem:[#allocation11 + $0x48] sm:$0xff] }
 0x3b1   : > { %v1359_v8 = vsel %vm1000_vm3, %v1353_v7, %v1354_v5  ;;  %v2500_v10 = vpop.f32.mrb[14].mxu0 }
 0x3b2   : > { %v1365_v13 = vadd.f32 %v1359_v8, %v1233_v0  ;;  %v1356_v14 = vrot.slane %v2500_v10, 1  ;;  %v1344_v15 = vpop.f32.mrb[15].mxu0  ;;  %v1737_v0 = vld [vmem:[#allocation11 + $0x28] sm:$0xff]  ;;  %v1742_v8 = vld [vmem:[#allocation11 + $0x50] sm:$0xff]  ;;  %v1743_v10 = vld [vmem:[#allocation11 + $0x58] sm:$0xff] }
 0x3b3   : > { %v1355_v16 = vrot.slane %v1344_v15, 1 }
 0x3b4   : > { %v1360_v17 = vsel %vm1000_vm3, %v1356_v14, %v1353_v7  ;;  %v1376_v18 = vadd.f32 %v2002_v11, %v1365_v13  ;;  %v1744_v13 = vld [vmem:[#allocation11 + $0x60] sm:$0xff] }
 0x3b5   : > { %v1364_v19 = vsel %vm3759_vm4, %v1360_v17, 0.0  ;;  %v1357_v20 = vsel %vm1000_vm3, %v1355_v16, %v1356_v14  ;;  %v1358_v21 = vsel %vm1000_vm3, %v1354_v5, %v1355_v16  ;;  %v1740_v5 = vld [vmem:[#allocation11 + $0x40] sm:$0xff]  ;;  %v1745_v14 = vld [vmem:[#allocation11 + $0x68] sm:$0xff]  ;;  %v1746_v16 = vld [vmem:[#allocation11 + $0x70] sm:$0xff] }
 0x3b6   : > { %v1362_v22 = vsel %vm3763_vm5, %v1358_v21, 0.0  ;;  %v1367_v23 = vadd.f32 %v1357_v20, %v1243_v3  ;;  %v1380_v24 = vmax.f32 %v1376_v18, 0.0  ;;  %v1368_v25 = vadd.f32 %v1364_v19, %v1248_v1  ;;  %v1739_v3 = vld [vmem:[#allocation11 + $0x38] sm:$0xff] }
 0x3b7   : > { %v1366_v26 = vadd.f32 %v1362_v22, %v1238_v55  ;;  %v1615_v55 = vld [vmem:[#allocation10 + $0x178] sm:$0xff]  ;;  %v2981_v1 = vpack.c.bf16 %v1737_v0, %v1736_v63  ;;  %v2985_v4 = vpack.c.bf16 %v1739_v3, %v1738_v2  ;;  %v2989_v7 = vpack.c.bf16 %v1741_v6, %v1740_v5 }
 0x3b8   : > { %2533 = vmatprep.mubr.f32.mxu1 %v1380_v24  ;;  %2571 = vmatprep.mubr.f32.mxu0 %v1380_v24  ;;  %v1378_v27 = vadd.f32 %v2002_v11, %v1367_v23  ;;  %v1379_v35 = vadd.f32 %v2002_v11, %v1368_v25  ;;  %v2969_v56 = vpack.c.bf16 %v1615_v55, %v1614_v54  ;;  %v1747_v17 = vld [vmem:[#allocation11 + $0x78] sm:$0xff] }
 0x3b9   : > { %v1377_v30 = vadd.f32 %v2002_v11, %v1366_v26  ;;  %v2993_v11 = vpack.c.bf16 %v1743_v10, %v1742_v8  ;;  %v2997_v15 = vpack.c.bf16 %v1745_v14, %v1744_v13  ;;  %v3001_v18 = vpack.c.bf16 %v1747_v17, %v1746_v16 }
 0x3ba   : > { %v1382_v36 = vmax.f32 %v1378_v27, 0.0  ;;  %v1383_v39 = vmax.f32 %v1379_v35, 0.0 }
 0x3bb   : > { %v1381_v32 = vmax.f32 %v1377_v30, 0.0 }
 0x3bd   : > { %2534 = vmatmul.mubr.f32.vlgmr.msra.gmra.mrb[12].mxu1 %v1381_v32  ;;  %2572 = vmatmul.mubr.f32.vlgmr.msra.gmra.mrb[16].mxu0 %v1381_v32 }
 0x3be   : > { %2944 = vmatpush3.bf16.msra.mxu1 %v2941_v44  ;;  %2536 = vmatprep.mubr.f32.mxu1 %v1382_v36  ;;  %v1611_v44 = vld [vmem:[#allocation10 + $0x158] sm:$0xff] }
 0x3bf   : > { %2574 = vmatprep.mubr.f32.mxu0 %v1382_v36  ;;  %2946 = vmatprep.subr.bf16.mxu1 %v2945_v34  ;;  %v2961_v49 = vpack.c.bf16 %v1611_v44, %v1610_v48  ;;  %v2003_v44 = vld [vmem:[%s3933_s22] ss:$0 sm:$0xff]  ;;  %s3296_s22 = sshll.u32 %s3380_s28, 4  ;;  %s3297_s22 = int_to_ptr.vmem [resolvable:$false] %s3296_s22 }
 0x3c0   : > { %2976 = vmatpush3.bf16.msra.mxu0 %v2973_v60  ;;  %s3298_s27 = scalar_lea.vmem %s3297_s22, 1024  ;;  %p3299_p13 = scmp.lt.s32.totalorder %s3838_s15, %s3297_s22 }
 0x3c1   : > { %2537 = vmatmul.mubr.f32.gmra.mrb[14].mxu1 %v1383_v39  ;;  %2575 = vmatmul.mubr.f32.gmra.mrb[18].mxu0 %v1383_v39  ;;  %p3300_p0 = scmp.lt.s32.totalorder %s3298_s27, %s3292_s25 }
 0x3c2   : > { %2948 = vmatpush3.bf16.msra.mxu1 %v2945_v34  ;;  %2609 = vmatprep.mubr.f32.mxu1 %v1380_v24 }
 0x3c3   : > { %2950 = vmatprep.subr.bf16.mxu1 %v2949_v40  ;;  %2978 = vmatprep.subr.bf16.mxu0 %v2977_v62  ;;  %p3301_p2 = por %p3300_p0, %p3299_p13 }
 0x3c4   : > { %2980 = vmatpush3.bf16.msra.mxu0 %v2977_v62 }
 0x3c5   : > { %2982 = vmatprep.subr.bf16.mxu0 %v2981_v1  ;;  %p3302_p8 = pnand %p3301_p2, %p3295_p1 }
 0x3c6   : > { %2952 = vmatpush3.bf16.msra.mxu1 %v2949_v40 }
 0x3c7   : > { %2954 = vmatprep.subr.bf16.mxu1 %v2953_v43 }
 0x3c8   : > { %2984 = vmatpush3.bf16.msra.mxu0 %v2981_v1 }
 0x3c9   : > { %2986 = vmatprep.subr.bf16.mxu0 %v2985_v4 }
 0x3ca   : > { %2956 = vmatpush3.bf16.msra.mxu1 %v2953_v43 }
 0x3cb   : > { %2958 = vmatprep.subr.bf16.mxu1 %v2957_v46 }
 0x3cc   : > { %2988 = vmatpush3.bf16.msra.mxu0 %v2985_v4 }
 0x3cd   : > { %2990 = vmatprep.subr.bf16.mxu0 %v2989_v7 }
 0x3ce   : > { %2960 = vmatpush3.bf16.msra.mxu1 %v2957_v46 }
 0x3cf   : > { %2962 = vmatprep.subr.bf16.mxu1 %v2961_v49 }
 0x3d0   : > { %2992 = vmatpush3.bf16.msra.mxu0 %v2989_v7 }
 0x3d1   : > { %2994 = vmatprep.subr.bf16.mxu0 %v2993_v11 }
 0x3d2   : > { %2964 = vmatpush3.bf16.msra.mxu1 %v2961_v49 }
 0x3d3   : > { %2966 = vmatprep.subr.bf16.mxu1 %v2965_v53 }
 0x3d4   : > { %2996 = vmatpush3.bf16.msra.mxu0 %v2993_v11 }
 0x3d5   : > { %2998 = vmatprep.subr.bf16.mxu0 %v2997_v15 }
 0x3d6   : > { %2968 = vmatpush3.bf16.msra.mxu1 %v2965_v53 }
 0x3d7   : > { %2970 = vmatprep.subr.bf16.mxu1 %v2969_v56 }
 0x3d8   : > { %3000 = vmatpush3.bf16.msra.mxu0 %v2997_v15 }
 0x3d9   : > { %3002 = vmatprep.subr.bf16.mxu0 %v3001_v18 }
 0x3da   : > { %2972 = vmatpush3.bf16.msra.mxu1 %v2969_v56 }
 0x3db   : > { %3005 = vmatprep.subr.bf16.mxu1 %v2973_v60 }
 0x3dc   : > { %3004 = vmatpush3.bf16.msra.mxu0 %v3001_v18 }
 0x3dd   : > { %2610 = vmatmul.mubr.f32.vlgmr.msra.gmra.mrb[16].mxu1 %v1381_v32 }
 0x3de   : > { %2612 = vmatprep.mubr.f32.mxu1 %v1382_v36  ;;  %3013 = vmatpush3.bf16.msra.mxu1 %v2973_v60 }
 0x3df   : > { %3006 = vmatprep.subr.bf16.mxu1 %v2977_v62 }
 0x3e1   : > { %2613 = vmatmul.mubr.f32.gmra.mrb[18].mxu1 %v1383_v39 }
 0x3e2   : > { %3014 = vmatpush3.bf16.msra.mxu1 %v2977_v62 }
 0x3e3   : > { %3007 = vmatprep.subr.bf16.mxu1 %v2981_v1 }
 0x3e6   : > { %3015 = vmatpush3.bf16.msra.mxu1 %v2981_v1 }
 0x3e7   : > { %3008 = vmatprep.subr.bf16.mxu1 %v2985_v4 }
 0x3ea   : > { %3016 = vmatpush3.bf16.msra.mxu1 %v2985_v4 }
 0x3eb   : > { %3009 = vmatprep.subr.bf16.mxu1 %v2989_v7 }
 0x3ee   : > { %3017 = vmatpush3.bf16.msra.mxu1 %v2989_v7 }
 0x3ef   : > { %3010 = vmatprep.subr.bf16.mxu1 %v2993_v11 }
 0x3f2   : > { %3018 = vmatpush3.bf16.msra.mxu1 %v2993_v11 }
 0x3f3   : > { %3011 = vmatprep.subr.bf16.mxu1 %v2997_v15 }
 0x3f6   : > { %3019 = vmatpush3.bf16.msra.mxu1 %v2997_v15 }
 0x3f7   : > { %3012 = vmatprep.subr.bf16.mxu1 %v3001_v18 }
 0x3fa   : > { %3020 = vmatpush3.bf16.msra.mxu1 %v3001_v18 }
 0x490   : > { %v2535_v19 = vpop.f32.mrb[12].mxu1  ;;  %v2573_v20 = vpop.f32.mrb[16].mxu0 }
 0x491   : > { %v1503_v21 = vrot.slane %v2535_v19, 7  ;;  %v1483_v22 = vpop.f32.mrb[13].mxu1  ;;  %v1580_v23 = vpop.f32.mrb[17].mxu0 }
 0x492   : > { %v1502_v24 = vrot.slane %v1483_v22, 7 }
 0x494   : > { %v1508_v25 = vsel %vm792_vm0, %v1502_v24, %v1503_v21  ;;  %v2538_v26 = vpop.f32.mrb[14].mxu1  ;;  %v2576_v27 = vpop.f32.mrb[18].mxu0 }
 0x495   : > { %v1586_v28 = vadd.f32 %v2573_v20, %v1508_v25  ;;  %v1505_v29 = vrot.slane %v2538_v26, 7  ;;  %v1493_v30 = vpop.f32.mrb[15].mxu1  ;;  %v1590_v32 = vpop.f32.mrb[19].mxu0 }
 0x496   : > { %v1504_v34 = vrot.slane %v1493_v30, 7 }
 0x497   : > { %v1509_v35 = vsel %vm792_vm0, %v1505_v29, %v1502_v24 }
 0x498   : > { %v1510_v36 = vsel %vm3733_vm1, %v1509_v35, 0.0  ;;  %v1506_v37 = vsel %vm792_vm0, %v1504_v34, %v1505_v29  ;;  %v1507_v38 = vsel %vm792_vm0, %v1503_v21, %v1504_v34 }
 0x499   : > { %v1581_v39 = vadd.f32 %v1580_v23, %v1510_v36  ;;  %v1596_v40 = vadd.f32 %v2576_v27, %v1506_v37  ;;  %v1512_v41 = vsel %vm3737_vm2, %v1507_v38, 0.0 }
 0x49a   : > { %v1591_v42 = vadd.f32 %v1590_v32, %v1512_v41 }
 0x4b0   : > { %v2611_v43 = vpop.f32.mrb[16].mxu1 }
 0x4b1   : > { %v1702_v31 = vrot.slane %v2611_v43, 1  ;;  %v1682_v45 = vpop.f32.mrb[17].mxu1 }
 0x4b2   : > { %v1701_v46 = vrot.slane %v1682_v45, 1 }
 0x4b4   : > { %v1707_v47 = vsel %vm1000_vm3, %v1701_v46, %v1702_v31  ;;  %v2614_v48 = vpop.f32.mrb[18].mxu1 }
 0x4b5   : > { %v1713_v49 = vadd.f32 %v1707_v47, %v1581_v39  ;;  %v1704_v50 = vrot.slane %v2614_v48, 1  ;;  %v1692_v51 = vpop.f32.mrb[19].mxu1 }
 0x4b6   : > { %v1703_v53 = vrot.slane %v1692_v51, 1 }
 0x4b7   : > { %v1708_v52 = vsel %vm1000_vm3, %v1704_v50, %v1701_v46  ;;  %v1724_v54 = vadd.f32 %v2003_v44, %v1713_v49 }
 0x4b8   : > { %v1712_v55 = vsel %vm3759_vm4, %v1708_v52, 0.0  ;;  %v1705_v56 = vsel %vm1000_vm3, %v1703_v53, %v1704_v50  ;;  %v1706_v57 = vsel %vm1000_vm3, %v1702_v31, %v1703_v53 }
 0x4b9   : > { %v1716_v58 = vadd.f32 %v1712_v55, %v1596_v40  ;;  %v1710_v59 = vsel %vm3763_vm5, %v1706_v57, 0.0  ;;  %v1715_v60 = vadd.f32 %v1705_v56, %v1591_v42  ;;  %v1728_v61 = vmax.f32 %v1724_v54, 0.0 }
 0x4ba   : > { %v1714_v62 = vadd.f32 %v1710_v59, %v1586_v28 }
 0x4bb   : > { %2647 = vmatprep.mubr.f32.mxu0 %v1728_v61  ;;  %v1726_v63 = vadd.f32 %v2003_v44, %v1715_v60  ;;  %v1727_v0 = vadd.f32 %v2003_v44, %v1716_v58 }
 0x4bc   : > { %v1725_v9 = vadd.f32 %v2003_v44, %v1714_v62 }
 0x4bd   : > { %v1730_v1 = vmax.f32 %v1726_v63, 0.0  ;;  %v1731_v2 = vmax.f32 %v1727_v0, 0.0 }
 0x4be   : > { %v1729_v3 = vmax.f32 %v1725_v9, 0.0 }
 0x4bf   : > { %2650 = vmatprep.mubr.f32.mxu1 %v1730_v1 }
 0x4c0   : > { %2648 = vmatmul.mubr.f32.vlgmr.msra.gmra.mrb[20].mxu0 %v1729_v3  ;;  %2651 = vmatmul.mubr.f32.vlgmr.msra.gmra.mrb[20].mxu1 %v1731_v2 }
 0x593   : > { %v2649_v12 = vpop.f32.mrb[20].mxu0  ;;  %v2652_v4 = vpop.f32.mrb[20].mxu1 }
 0x594   : > { %v1827_v5 = vadd.f32 %v2649_v12, %v2004_v33  ;;  %v1837_v6 = vadd.f32 %v2652_v4, %v2004_v33  ;;  %v1821_v7 = vpop.f32.mrb[21].mxu0  ;;  %v1831_v8 = vpop.f32.mrb[21].mxu1 }
 0x595   : > { %v1822_v10 = vadd.f32 %v2004_v33, %v1821_v7  ;;  %v1832_v11 = vadd.f32 %v2004_v33, %v1831_v8 }
 0x596   : > { %1841 = vst [vmem:[%s478_s30 + $0x8] sm:$0xff] %v1827_v5  ;;  %1843 = vst [vmem:[%s478_s30 + $0x18] sm:$0xff] %v1837_v6 }
 0x597   : > { %1840 = vst [vmem:[%s478_s30] sm:$0xff] %v1822_v10  ;;  %1842 = vst [vmem:[%s478_s30 + $0x10] sm:$0xff] %v1832_v11 }
 0x598   : > { %3305 = shalt.err (!%p3302_p8)
}
 0x599   : > { %s3306_s30 = scalar_lea.hbm %s3843_s8, 512  ;;  %s3310_s13 = scalar_lea.hbm %s3935_s1, 1024 }
 0x59a   : > { %p3307_p6 = scmp.ne.s32.totalorder %s3843_s8, %s3306_s30  ;;  %p3311_p3 = scmp.lt.u32.totalorder %s3843_s8, %s3935_s1 }
 0x59b   : > { %p3312_p5 = scmp.lt.u32.totalorder %s3310_s13, %s3306_s30  ;;  %p3314_p7 = scmp.lt.u32.totalorder %s3306_s30, %s3843_s8 }
 0x59c   : > { %p3308_p10 = pnand %p3307_p6, %p3936_p4 }
 0x59d   : > { %p3313_p9 = por %p3312_p5, %p3311_p3 }
 0x59e   : > { %p3309_p11 = pneg %p3308_p10 }
 0x59f   : > { %p3315_p12 = por %p3314_p7, %p3313_p9 }
 0x5a1   : > { %p3316_p1 = pnand %p3315_p12, %p3309_p11 }
 0x5a3   : > { %3319 = shalt.err (!%p3316_p1)
}
 0x5a4   : > { %s3381_s25 = smov 128   ;;  %s3382_s28 = smov 8  }
 0x5a5   : > { %3043 = dma.vmem_to_hbm [thread:$0]  (%p3936_p4), %s3838_s15, 512, %s3843_s8, %s1845_s23, %s3381_s25, %s3381_s25, %s3382_s28  }
 0x5a6 PF: > { %s1874_s22 = sand.u32 1, %s3358_s17   ;;  %p3937_p13 = scmp.ne.s32.totalorder %s3915_s21, 0 }
 0x5a7   : > { %p3938_p0 = scmp.ge.s32.totalorder %s3370_s20, 2  ;;  %s1875_s27 = scalar_lea.sflag [#allocation4], %s1874_s22 }
 0x5a9   : > { %p3066_p2 = pnand %p3938_p0, %p3937_p13 }
 0x5ab   : > { %3353 = dma.done.wait (!%p3066_p2), %s1875_s27, 512  }
 0x5ac   : > { %3355 = vsyncadd (!%p3066_p2), %s1875_s27, 4294966784  ;;  %p27_p8 = scmp.ge.s32.totalorder %s3616_s16, 4   ;;  %s3939_s17 = smov %s3362_s18 }
 0x5ad   : > { %s3940_s18 = smov %s3366_s19  ;;  %s3941_s19 = smov %s3628_s10 }
 0x5ae   : > { %s3942_s20 = smov %s3616_s16  ;;  %29 = sbr.rel (!%p27_p8) target bundleno = 13 (0xd), region = 135 }
 0x5b5   :  { %1880 = vsyncpa [#allocation3], 1 }
 0x5b6   :  { %1882 = vsyncpa [#allocation3 + $0x1], 1 }
 0x5b7   :  { %1883 = vsyncpa [#allocation6], 1 }
 0x5b8   :  { %1884 = vsyncpa [#allocation9], 1 }
 0x5b9   :  { %1885 = vsyncpa [#allocation12], 1 }
 0x5ba   :  { %1886 = vsyncpa [#allocation4], 1 }
 0x5bb   :  { %1888 = vsyncpa [#allocation4 + $0x1], 1 }

</bundles_post_ra>
